<compile_context>
chip_gen: v5e
topology: v5e:2x2
jax: 0.10.0
libtpu: 0.0.40
codegen_flags: <defaults>
</compile_context>

<pallas_src>
import functools

import jax
import jax.numpy as jnp
from jax.experimental import pallas as pl
from jax.experimental.pallas import tpu as pltpu


def _round_up(x, m):
    return ((x + m - 1) // m) * m


def _pad_axis(x, size, axis):
    pad = size - x.shape[axis]
    if pad <= 0:
        return x
    widths = [(0, 0)] * x.ndim
    widths[axis] = (0, pad)
    return jnp.pad(x, widths)


def _pick_k_tile(k, max_tile):
    """Largest multiple of 128 <= max_tile that divides round_up(k, 128)."""
    kp = _round_up(k, 128)
    cap = max(128, (min(max_tile, kp) // 128) * 128)
    for t in range(cap, 0, -128):
        if kp % t == 0:
            return t, kp
    return 128, kp


# ----------------------------------------------------------------------------
# Pallas kernels: K-tiled matmul, f32 accumulator seeded with bias, fused
# residual add + ReLU in the epilogue.
# ----------------------------------------------------------------------------
def _mm_bias_relu_kernel(x_ref, w_ref, b_ref, o_ref, acc_ref):
    k = pl.program_id(1)

    @pl.when(k == 0)
    def _():
        # Seed accumulator with the folded-BN bias (broadcast over rows).
        acc_ref[...] = jnp.broadcast_to(b_ref[...], acc_ref.shape)

    acc_ref[...] += jnp.dot(x_ref[...], w_ref[...],
                            preferred_element_type=jnp.float32)

    @pl.when(k == pl.num_programs(1) - 1)
    def _():
        o_ref[...] = jnp.maximum(acc_ref[...], 0.0).astype(o_ref.dtype)


def _mm_bias_add_relu_kernel(x_ref, w_ref, b_ref, r_ref, o_ref, acc_ref):
    k = pl.program_id(1)

    @pl.when(k == 0)
    def _():
        acc_ref[...] = jnp.broadcast_to(b_ref[...], acc_ref.shape)

    acc_ref[...] += jnp.dot(x_ref[...], w_ref[...],
                            preferred_element_type=jnp.float32)

    @pl.when(k == pl.num_programs(1) - 1)
    def _():
        y = acc_ref[...] + r_ref[...].astype(jnp.float32)
        o_ref[...] = jnp.maximum(y, 0.0).astype(o_ref.dtype)


def fused_matmul_bias_relu(x, w, bias, residual=None, *,
                           out_dtype=jnp.bfloat16, tm_max=512, tk_max=512):
    """y = relu(x @ w + bias [+ residual]).

    x:        (M, K)  bf16  (BN scale already folded into w; K multiple of 128)
    w:        (K, Nc) bf16  (Nc multiple of 128 -> lane-dense output)
    bias:     (1, Nc) f32
    residual: (M, Nc) f32   (optional)
    """
    M, K = x.shape
    Kw, Nc = w.shape
    assert K == Kw and Nc % 128 == 0 and K % 128 == 0, (x.shape, w.shape)

    # Tile selection.  K tile divides K exactly (K is already 128-aligned by
    # the caller), so no zero-K work.  M is zero-padded to the tile multiple.
    tk, Kp = _pick_k_tile(K, tk_max)
    assert Kp == K
    tm = min(tm_max, _round_up(M, 16))           # bf16 sublane-aligned
    Mp = _round_up(M, tm)

    x = _pad_axis(x, Mp, 0)
    if residual is not None:
        residual = _pad_axis(residual, Mp, 0)

    grid = (Mp // tm, K // tk)

    in_specs = [
        pl.BlockSpec((tm, tk), lambda i, k: (i, k)),
        pl.BlockSpec((tk, Nc), lambda i, k: (k, 0)),
        pl.BlockSpec((1, Nc), lambda i, k: (0, 0)),   # k-invariant: fetched once
    ]
    args = [x, w, bias]
    if residual is None:
        kernel = _mm_bias_relu_kernel
    else:
        kernel = _mm_bias_add_relu_kernel
        in_specs.append(pl.BlockSpec((tm, Nc), lambda i, k: (i, 0)))
        args.append(residual)

    out = pl.pallas_call(
        kernel,
        out_shape=jax.ShapeDtypeStruct((Mp, Nc), out_dtype),
        grid=grid,
        in_specs=in_specs,
        out_specs=pl.BlockSpec((tm, Nc), lambda i, k: (i, 0)),
        scratch_shapes=[pltpu.VMEM((tm, Nc), jnp.float32)],
        compiler_params=pltpu.CompilerParams(
            dimension_semantics=("parallel", "arbitrary")),
    )(*args)
    return out[:M]


# ----------------------------------------------------------------------------
# Glue: im2col, BN folding, parameter init
# ----------------------------------------------------------------------------
def _im2col_3x3(x_nhwc, stride=1, dilation=1):
    """3x3 patches (padding=dilation) -> (N*Ho*Wo, 9*C), tap-major (kh, kw, C)."""
    N, H, W, C = x_nhwc.shape
    pad = dilation
    xp = jnp.pad(x_nhwc, ((0, 0), (pad, pad), (pad, pad), (0, 0)))
    Ho = (H + 2 * pad - dilation * 2 - 1) // stride + 1
    Wo = (W + 2 * pad - dilation * 2 - 1) // stride + 1
    patches = []
    for kh in range(3):
        for kw in range(3):
            h0 = kh * dilation
            w0 = kw * dilation
            sl = xp[:, h0:h0 + stride * (Ho - 1) + 1:stride,
                    w0:w0 + stride * (Wo - 1) + 1:stride, :]
            patches.append(sl)
    cols = jnp.concatenate(patches, axis=-1)            # (N, Ho, Wo, 9*C)
    return cols.reshape(N * Ho * Wo, 9 * C), (N, Ho, Wo)


def _fold_bn(gamma, beta, running_mean, running_var, eps=1e-5):
    scale = gamma / jnp.sqrt(running_var + eps)
    bias = beta - running_mean * scale
    return scale.reshape(1, -1), bias.reshape(1, -1)


def init_bottleneck_params(key, inplanes, planes, base_width=64, groups=1):
    """Deterministic parameter init matching the PyTorch module's shapes."""
    width = int(planes * (base_width / 64.0)) * groups
    out_planes = planes * 4  # expansion = 4
    keys = jax.random.split(key, 15)

    def bn_params(k0, k1, k2, k3, c):
        gamma = jax.random.uniform(k0, (c,), jnp.float32, 0.5, 1.5)
        beta = 0.1 * jax.random.normal(k1, (c,), jnp.float32)
        rmean = 0.1 * jax.random.normal(k2, (c,), jnp.float32)
        rvar = jax.random.uniform(k3, (c,), jnp.float32, 0.5, 1.5)
        return gamma, beta, rmean, rvar

    params = {
        # PyTorch conv weight layouts: (Cout, Cin, kh, kw)
        "w1": 0.1 * jax.random.normal(keys[0], (width, inplanes, 1, 1), jnp.float32),
        "w2": 0.1 * jax.random.normal(keys[1], (width, width, 3, 3), jnp.float32),
        "w3": 0.1 * jax.random.normal(keys[2], (out_planes, width, 1, 1), jnp.float32),
        "bn1": bn_params(keys[3], keys[4], keys[5], keys[6], width),
        "bn2": bn_params(keys[7], keys[8], keys[9], keys[10], width),
        "bn3": bn_params(keys[11], keys[12], keys[13], keys[14], out_planes),
    }
    return params, width, out_planes


def bottleneck_forward(x_nchw, params, stride=1, dilation=1,
                       tm_max=512, tk_max=512):
    """Forward of the ResNet Bottleneck (downsample=None, groups=1)."""
    N, Cin, H, W = x_nchw.shape
    width = params["w1"].shape[0]
    out_planes = params["w3"].shape[0]

    # downsample is None in this configuration => identity residual must match.
    assert stride == 1 and Cin == out_planes, (
        "identity residual (downsample=None) requires stride == 1 and "
        "inplanes == planes * expansion")

    s1, b1 = _fold_bn(*params["bn1"])
    s2, b2 = _fold_bn(*params["bn2"])
    s3, b3 = _fold_bn(*params["bn3"])

    # Fold BN scale into the conv weights (free at runtime under jit).
    w1 = jnp.transpose(params["w1"][:, :, 0, 0], (1, 0)) * s1        # (Cin, width)
    w2 = jnp.transpose(params["w2"], (2, 3, 1, 0)) * s2.reshape(1, 1, 1, -1)
    w3 = jnp.transpose(params["w3"][:, :, 0, 0], (1, 0)) * s3        # (width, out)

    # Lane-dense channel padding (multiples of 128).  Zero-padded channels stay
    # zero through conv + bias(=0) + ReLU, so real-channel results are exact.
    Cin_p = _round_up(Cin, 128)
    Wd_p = _round_up(width, 128)
    Out_p = _round_up(out_planes, 128)

    w1p = _pad_axis(_pad_axis(w1, Cin_p, 0), Wd_p, 1).astype(jnp.bfloat16)
    w2p = _pad_axis(_pad_axis(w2, Wd_p, 2), Wd_p, 3)                 # (3,3,Wd_p,Wd_p)
    w2p = w2p.reshape(9 * Wd_p, Wd_p).astype(jnp.bfloat16)           # (kh,kw,Cin) rows
    w3p = _pad_axis(_pad_axis(w3, Wd_p, 0), Out_p, 1).astype(jnp.bfloat16)

    b1p = _pad_axis(b1, Wd_p, 1).astype(jnp.float32)
    b2p = _pad_axis(b2, Wd_p, 1).astype(jnp.float32)
    b3p = _pad_axis(b3, Out_p, 1).astype(jnp.float32)

    x_nhwc = jnp.transpose(x_nchw, (0, 2, 3, 1))                     # NCHW -> NHWC
    x_flat = _pad_axis(x_nhwc.reshape(N * H * W, Cin), Cin_p, 1)     # f32 (M, Cin_p)
    x_bf = x_flat.astype(jnp.bfloat16)

    # --- conv1 (1x1) + bn1 + relu -------------------------------------------
    out1 = fused_matmul_bias_relu(x_bf, w1p, b1p,
                                  tm_max=tm_max, tk_max=tk_max)      # (M, Wd_p) bf16

    # --- conv2 (3x3, padding=dilation) + bn2 + relu ---------------------------
    out1_nhwc = out1.reshape(N, H, W, Wd_p)
    cols, (_, Ho, Wo) = _im2col_3x3(out1_nhwc, stride=stride, dilation=dilation)
    out2 = fused_matmul_bias_relu(cols, w2p, b2p,
                                  tm_max=tm_max, tk_max=tk_max)      # (M, Wd_p) bf16

    # --- conv3 (1x1) + bn3 + residual add + relu ------------------------------
    identity = x_flat                                                # f32, Cin_p == Out_p
    out3 = fused_matmul_bias_relu(out2, w3p, b3p, residual=identity,
                                  out_dtype=jnp.float32,
                                  tm_max=tm_max, tk_max=tk_max)      # (M, Out_p) f32

    out_nhwc = out3.reshape(N, Ho, Wo, Out_p)[..., :out_planes]
    return jnp.transpose(out_nhwc, (0, 3, 1, 2))                     # back to NCHW


# ----------------------------------------------------------------------------
# Pure-JAX reference (inference-mode BN) for a correctness check
# ----------------------------------------------------------------------------
def _reference_bottleneck(x, params, stride=1, dilation=1, eps=1e-5):
    def conv(x, w, stride, padding, dilation):
        return jax.lax.conv_general_dilated(
            x, w, window_strides=(stride, stride),
            padding=((padding, padding), (padding, padding)),
            rhs_dilation=(dilation, dilation),
            dimension_numbers=("NCHW", "OIHW", "NCHW"))

    def bn(y, p):
        gamma, beta, mean, var = p
        scale = gamma / jnp.sqrt(var + eps)
        bias = beta - mean * scale
        return y * scale[None, :, None, None] + bias[None, :, None, None]

    out = jax.nn.relu(bn(conv(x, params["w1"], 1, 0, 1), params["bn1"]))
    out = jax.nn.relu(bn(conv(out, params["w2"], stride, dilation, dilation),
                         params["bn2"]))
    out = bn(conv(out, params["w3"], 1, 0, 1), params["bn3"])
    return jax.nn.relu(out + x)


# ----------------------------------------------------------------------------
# Main
# ----------------------------------------------------------------------------
if __name__ == "__main__":
    # Small shapes: inplanes = planes * expansion so the identity branch is
    # valid with downsample=None (the PyTorch module's default configuration).
    N, inplanes, H, W = 2, 16, 8, 8
    planes = 4  # -> width = 4, out_planes = 16

    key = jax.random.PRNGKey(0)
    k_x, k_p = jax.random.split(key)
    x = jax.random.normal(k_x, (N, inplanes, H, W), jnp.float32)  # NCHW like PyTorch

    params, width, out_planes = init_bottleneck_params(k_p, inplanes, planes)
    assert inplanes == out_planes, "identity residual requires inplanes == planes*4"

    fwd = jax.jit(functools.partial(bottleneck_forward, stride=1, dilation=1))
    out = jax.block_until_ready(fwd(x, params))

    assert out.shape == (N, out_planes, H, W), out.shape
    assert bool(jnp.all(out >= 0.0))  # final ReLU

    ref = _reference_bottleneck(x, params, stride=1, dilation=1)
    max_err = float(jnp.max(jnp.abs(out - ref)))
    assert max_err < 5e-2, max_err   # bf16 operands, f32 accumulation

    print("KERNEL_OK")
</pallas_src>

<mosaic_0001>
module attributes {stable_mosaic.version = 11 : i64} {
  func.func @_mm_bias_relu_kernel(%arg0: i32, %arg1: i32, %arg2: memref<128x128xbf16, #tpu.memory_space<vmem>>, %arg3: memref<128x128xbf16, #tpu.memory_space<vmem>>, %arg4: memref<1x128xf32, #tpu.memory_space<vmem>>, %arg5: memref<128x128xbf16, #tpu.memory_space<vmem>>, %arg6: memref<128x128xf32, #tpu.memory_space<vmem>>) attributes {dimension_semantics = [#tpu.dimension_semantics<parallel>, #tpu.dimension_semantics<arbitrary>], iteration_bounds = array<i64: 1, 1>, scalar_prefetch = 0 : i64, scratch_operands = 1 : i64, tpu.core_type = #tpu.core_type<tc>, window_params = [{transform_indices = @transform_0, window_bounds = array<i64: 128, 128>}, {transform_indices = @transform_1, window_bounds = array<i64: 128, 128>}, {pipeline_mode = #tpu.pipeline_mode<synchronous>, transform_indices = @transform_2, window_bounds = array<i64: 1, 128>}, {transform_indices = @transform_3, window_bounds = array<i64: 128, 128>}]} {
    %c0_i32 = arith.constant 0 : i32
    %0 = arith.cmpi eq, %arg1, %c0_i32 : i32
    %1 = arith.extui %0 : i1 to i32
    %c0_i32_0 = arith.constant 0 : i32
    %2 = arith.cmpi ne, %1, %c0_i32_0 : i32
    scf.if %2 {
      %c0_10 = arith.constant 0 : index
      %c0_11 = arith.constant 0 : index
      %12 = vector.load %arg4[%c0_10, %c0_11] : memref<1x128xf32, #tpu.memory_space<vmem>>, vector<1x128xf32>
      %13 = vector.shape_cast %12 : vector<1x128xf32> to vector<1x128xf32>
      %14 = vector.broadcast %13 : vector<1x128xf32> to vector<128x128xf32>
      %c0_12 = arith.constant 0 : index
      %c0_13 = arith.constant 0 : index
      %15 = vector.load %arg6[%c0_12, %c0_13] : memref<128x128xf32, #tpu.memory_space<vmem>>, vector<128x128xf32>
      tpu.vector_store %arg6[%c0_12, %c0_13], %14 {strides = array<i32>} : memref<128x128xf32, #tpu.memory_space<vmem>>, vector<128x128xf32>,
    } else {
    }
    %c0 = arith.constant 0 : index
    %c0_1 = arith.constant 0 : index
    %3 = vector.load %arg6[%c0, %c0_1] : memref<128x128xf32, #tpu.memory_space<vmem>>, vector<128x128xf32>
    %c0_2 = arith.constant 0 : index
    %c0_3 = arith.constant 0 : index
    %4 = vector.load %arg2[%c0_2, %c0_3] : memref<128x128xbf16, #tpu.memory_space<vmem>>, vector<128x128xbf16>
    %c0_4 = arith.constant 0 : index
    %c0_5 = arith.constant 0 : index
    %5 = vector.load %arg3[%c0_4, %c0_5] : memref<128x128xbf16, #tpu.memory_space<vmem>>, vector<128x128xbf16>
    %cst = arith.constant dense<0.000000e+00> : vector<128x128xf32>
    %6 = tpu.matmul %4, %5, %cst {dimension_numbers = #tpu.dot_dimension_numbers<[1], [0], [0], [1], [0, 0, 1, 1], [], []>} : vector<128x128xbf16>, vector<128x128xbf16>, vector<128x128xf32> -> vector<128x128xf32>
    %7 = arith.addf %3, %6 : vector<128x128xf32>
    %c0_6 = arith.constant 0 : index
    %c0_7 = arith.constant 0 : index
    %8 = vector.load %arg6[%c0_6, %c0_7] : memref<128x128xf32, #tpu.memory_space<vmem>>, vector<128x128xf32>
    tpu.vector_store %arg6[%c0_6, %c0_7], %7 {strides = array<i32>} : memref<128x128xf32, #tpu.memory_space<vmem>>, vector<128x128xf32>,
    %c0_i32_8 = arith.constant 0 : i32
    %9 = arith.cmpi eq, %arg1, %c0_i32_8 : i32
    %10 = arith.extui %9 : i1 to i32
    %c0_i32_9 = arith.constant 0 : i32
    %11 = arith.cmpi ne, %10, %c0_i32_9 : i32
    scf.if %11 {
      %c0_10 = arith.constant 0 : index
      %c0_11 = arith.constant 0 : index
      %12 = vector.load %arg6[%c0_10, %c0_11] : memref<128x128xf32, #tpu.memory_space<vmem>>, vector<128x128xf32>
      %cst_12 = arith.constant 0.000000e+00 : f32
      %13 = vector.broadcast %cst_12 : f32 to vector<128x128xf32>
      %14 = arith.maximumf %12, %13 : vector<128x128xf32>
      %15 = arith.truncf %14 : vector<128x128xf32> to vector<128x128xbf16>
      %c0_13 = arith.constant 0 : index
      %c0_14 = arith.constant 0 : index
      %16 = vector.load %arg5[%c0_13, %c0_14] : memref<128x128xbf16, #tpu.memory_space<vmem>>, vector<128x128xbf16>
      tpu.vector_store %arg5[%c0_13, %c0_14], %15 {strides = array<i32>} : memref<128x128xbf16, #tpu.memory_space<vmem>>, vector<128x128xbf16>,
    } else {
    }
    return
  }
  func.func @transform_0(%arg0: i32, %arg1: i32) -> (i32, i32) {
    %c0_i32 = arith.constant 0 : i32
    return %arg0, %arg1 : i32, i32
  }
  func.func @transform_1(%arg0: i32, %arg1: i32) -> (i32, i32) {
    %c0_i32 = arith.constant 0 : i32
    %c0_i32_0 = arith.constant 0 : i32
    return %arg1, %c0_i32 : i32, i32
  }
  func.func @transform_2(%arg0: i32, %arg1: i32) -> (i32, i32) {
    %c0_i32 = arith.constant 0 : i32
    %c0_i32_0 = arith.constant 0 : i32
    %c0_i32_1 = arith.constant 0 : i32
    return %c0_i32, %c0_i32_0 : i32, i32
  }
  func.func @transform_3(%arg0: i32, %arg1: i32) -> (i32, i32) {
    %c0_i32 = arith.constant 0 : i32
    %c0_i32_0 = arith.constant 0 : i32
    return %arg0, %c0_i32 : i32, i32
  }
}

module attributes {stable_mosaic.version = 11 : i64} {
  func.func @_mm_bias_relu_kernel(%arg0: i32, %arg1: i32, %arg2: memref<128x384xbf16, #tpu.memory_space<vmem>>, %arg3: memref<384x128xbf16, #tpu.memory_space<vmem>>, %arg4: memref<1x128xf32, #tpu.memory_space<vmem>>, %arg5: memref<128x128xbf16, #tpu.memory_space<vmem>>, %arg6: memref<128x128xf32, #tpu.memory_space<vmem>>) attributes {dimension_semantics = [#tpu.dimension_semantics<parallel>, #tpu.dimension_semantics<arbitrary>], iteration_bounds = array<i64: 1, 3>, scalar_prefetch = 0 : i64, scratch_operands = 1 : i64, tpu.core_type = #tpu.core_type<tc>, window_params = [{transform_indices = @transform_0, window_bounds = array<i64: 128, 384>}, {transform_indices = @transform_1, window_bounds = array<i64: 384, 128>}, {pipeline_mode = #tpu.pipeline_mode<synchronous>, transform_indices = @transform_2, window_bounds = array<i64: 1, 128>}, {transform_indices = @transform_3, window_bounds = array<i64: 128, 128>}]} {
    %c0_i32 = arith.constant 0 : i32
    %0 = arith.cmpi eq, %arg1, %c0_i32 : i32
    %1 = arith.extui %0 : i1 to i32
    %c0_i32_0 = arith.constant 0 : i32
    %2 = arith.cmpi ne, %1, %c0_i32_0 : i32
    scf.if %2 {
      %c0_9 = arith.constant 0 : index
      %c0_10 = arith.constant 0 : index
      %12 = vector.load %arg4[%c0_9, %c0_10] : memref<1x128xf32, #tpu.memory_space<vmem>>, vector<1x128xf32>
      %13 = vector.shape_cast %12 : vector<1x128xf32> to vector<1x128xf32>
      %14 = vector.broadcast %13 : vector<1x128xf32> to vector<128x128xf32>
      %c0_11 = arith.constant 0 : index
      %c0_12 = arith.constant 0 : index
      %15 = vector.load %arg6[%c0_11, %c0_12] : memref<128x128xf32, #tpu.memory_space<vmem>>, vector<128x128xf32>
      tpu.vector_store %arg6[%c0_11, %c0_12], %14 {strides = array<i32>} : memref<128x128xf32, #tpu.memory_space<vmem>>, vector<128x128xf32>,
    } else {
    }
    %c0 = arith.constant 0 : index
    %c0_1 = arith.constant 0 : index
    %3 = vector.load %arg6[%c0, %c0_1] : memref<128x128xf32, #tpu.memory_space<vmem>>, vector<128x128xf32>
    %c0_2 = arith.constant 0 : index
    %c0_3 = arith.constant 0 : index
    %4 = vector.load %arg2[%c0_2, %c0_3] : memref<128x384xbf16, #tpu.memory_space<vmem>>, vector<128x384xbf16>
    %c0_4 = arith.constant 0 : index
    %c0_5 = arith.constant 0 : index
    %5 = vector.load %arg3[%c0_4, %c0_5] : memref<384x128xbf16, #tpu.memory_space<vmem>>, vector<384x128xbf16>
    %cst = arith.constant dense<0.000000e+00> : vector<128x128xf32>
    %6 = tpu.matmul %4, %5, %cst {dimension_numbers = #tpu.dot_dimension_numbers<[1], [0], [0], [1], [0, 0, 1, 1], [], []>} : vector<128x384xbf16>, vector<384x128xbf16>, vector<128x128xf32> -> vector<128x128xf32>
    %7 = arith.addf %3, %6 : vector<128x128xf32>
    %c0_6 = arith.constant 0 : index
    %c0_7 = arith.constant 0 : index
    %8 = vector.load %arg6[%c0_6, %c0_7] : memref<128x128xf32, #tpu.memory_space<vmem>>, vector<128x128xf32>
    tpu.vector_store %arg6[%c0_6, %c0_7], %7 {strides = array<i32>} : memref<128x128xf32, #tpu.memory_space<vmem>>, vector<128x128xf32>,
    %c2_i32 = arith.constant 2 : i32
    %9 = arith.cmpi eq, %arg1, %c2_i32 : i32
    %10 = arith.extui %9 : i1 to i32
    %c0_i32_8 = arith.constant 0 : i32
    %11 = arith.cmpi ne, %10, %c0_i32_8 : i32
    scf.if %11 {
      %c0_9 = arith.constant 0 : index
      %c0_10 = arith.constant 0 : index
      %12 = vector.load %arg6[%c0_9, %c0_10] : memref<128x128xf32, #tpu.memory_space<vmem>>, vector<128x128xf32>
      %cst_11 = arith.constant 0.000000e+00 : f32
      %13 = vector.broadcast %cst_11 : f32 to vector<128x128xf32>
      %14 = arith.maximumf %12, %13 : vector<128x128xf32>
      %15 = arith.truncf %14 : vector<128x128xf32> to vector<128x128xbf16>
      %c0_12 = arith.constant 0 : index
      %c0_13 = arith.constant 0 : index
      %16 = vector.load %arg5[%c0_12, %c0_13] : memref<128x128xbf16, #tpu.memory_space<vmem>>, vector<128x128xbf16>
      tpu.vector_store %arg5[%c0_12, %c0_13], %15 {strides = array<i32>} : memref<128x128xbf16, #tpu.memory_space<vmem>>, vector<128x128xbf16>,
    } else {
    }
    return
  }
  func.func @transform_0(%arg0: i32, %arg1: i32) -> (i32, i32) {
    %c0_i32 = arith.constant 0 : i32
    return %arg0, %arg1 : i32, i32
  }
  func.func @transform_1(%arg0: i32, %arg1: i32) -> (i32, i32) {
    %c0_i32 = arith.constant 0 : i32
    %c0_i32_0 = arith.constant 0 : i32
    return %arg1, %c0_i32 : i32, i32
  }
  func.func @transform_2(%arg0: i32, %arg1: i32) -> (i32, i32) {
    %c0_i32 = arith.constant 0 : i32
    %c0_i32_0 = arith.constant 0 : i32
    %c0_i32_1 = arith.constant 0 : i32
    return %c0_i32, %c0_i32_0 : i32, i32
  }
  func.func @transform_3(%arg0: i32, %arg1: i32) -> (i32, i32) {
    %c0_i32 = arith.constant 0 : i32
    %c0_i32_0 = arith.constant 0 : i32
    return %arg0, %c0_i32 : i32, i32
  }
}

module attributes {stable_mosaic.version = 11 : i64} {
  func.func @_mm_bias_add_relu_kernel(%arg0: i32, %arg1: i32, %arg2: memref<128x128xbf16, #tpu.memory_space<vmem>>, %arg3: memref<128x128xbf16, #tpu.memory_space<vmem>>, %arg4: memref<1x128xf32, #tpu.memory_space<vmem>>, %arg5: memref<128x128xf32, #tpu.memory_space<vmem>>, %arg6: memref<128x128xf32, #tpu.memory_space<vmem>>, %arg7: memref<128x128xf32, #tpu.memory_space<vmem>>) attributes {dimension_semantics = [#tpu.dimension_semantics<parallel>, #tpu.dimension_semantics<arbitrary>], iteration_bounds = array<i64: 1, 1>, scalar_prefetch = 0 : i64, scratch_operands = 1 : i64, tpu.core_type = #tpu.core_type<tc>, window_params = [{transform_indices = @transform_0, window_bounds = array<i64: 128, 128>}, {transform_indices = @transform_1, window_bounds = array<i64: 128, 128>}, {pipeline_mode = #tpu.pipeline_mode<synchronous>, transform_indices = @transform_2, window_bounds = array<i64: 1, 128>}, {transform_indices = @transform_3, window_bounds = array<i64: 128, 128>}, {transform_indices = @transform_4, window_bounds = array<i64: 128, 128>}]} {
    %c0_i32 = arith.constant 0 : i32
    %0 = arith.cmpi eq, %arg1, %c0_i32 : i32
    %1 = arith.extui %0 : i1 to i32
    %c0_i32_0 = arith.constant 0 : i32
    %2 = arith.cmpi ne, %1, %c0_i32_0 : i32
    scf.if %2 {
      %c0_10 = arith.constant 0 : index
      %c0_11 = arith.constant 0 : index
      %12 = vector.load %arg4[%c0_10, %c0_11] : memref<1x128xf32, #tpu.memory_space<vmem>>, vector<1x128xf32>
      %13 = vector.shape_cast %12 : vector<1x128xf32> to vector<1x128xf32>
      %14 = vector.broadcast %13 : vector<1x128xf32> to vector<128x128xf32>
      %c0_12 = arith.constant 0 : index
      %c0_13 = arith.constant 0 : index
      %15 = vector.load %arg7[%c0_12, %c0_13] : memref<128x128xf32, #tpu.memory_space<vmem>>, vector<128x128xf32>
      tpu.vector_store %arg7[%c0_12, %c0_13], %14 {strides = array<i32>} : memref<128x128xf32, #tpu.memory_space<vmem>>, vector<128x128xf32>,
    } else {
    }
    %c0 = arith.constant 0 : index
    %c0_1 = arith.constant 0 : index
    %3 = vector.load %arg7[%c0, %c0_1] : memref<128x128xf32, #tpu.memory_space<vmem>>, vector<128x128xf32>
    %c0_2 = arith.constant 0 : index
    %c0_3 = arith.constant 0 : index
    %4 = vector.load %arg2[%c0_2, %c0_3] : memref<128x128xbf16, #tpu.memory_space<vmem>>, vector<128x128xbf16>
    %c0_4 = arith.constant 0 : index
    %c0_5 = arith.constant 0 : index
    %5 = vector.load %arg3[%c0_4, %c0_5] : memref<128x128xbf16, #tpu.memory_space<vmem>>, vector<128x128xbf16>
    %cst = arith.constant dense<0.000000e+00> : vector<128x128xf32>
    %6 = tpu.matmul %4, %5, %cst {dimension_numbers = #tpu.dot_dimension_numbers<[1], [0], [0], [1], [0, 0, 1, 1], [], []>} : vector<128x128xbf16>, vector<128x128xbf16>, vector<128x128xf32> -> vector<128x128xf32>
    %7 = arith.addf %3, %6 : vector<128x128xf32>
    %c0_6 = arith.constant 0 : index
    %c0_7 = arith.constant 0 : index
    %8 = vector.load %arg7[%c0_6, %c0_7] : memref<128x128xf32, #tpu.memory_space<vmem>>, vector<128x128xf32>
    tpu.vector_store %arg7[%c0_6, %c0_7], %7 {strides = array<i32>} : memref<128x128xf32, #tpu.memory_space<vmem>>, vector<128x128xf32>,
    %c0_i32_8 = arith.constant 0 : i32
    %9 = arith.cmpi eq, %arg1, %c0_i32_8 : i32
    %10 = arith.extui %9 : i1 to i32
    %c0_i32_9 = arith.constant 0 : i32
    %11 = arith.cmpi ne, %10, %c0_i32_9 : i32
    scf.if %11 {
      %c0_10 = arith.constant 0 : index
      %c0_11 = arith.constant 0 : index
      %12 = vector.load %arg7[%c0_10, %c0_11] : memref<128x128xf32, #tpu.memory_space<vmem>>, vector<128x128xf32>
      %c0_12 = arith.constant 0 : index
      %c0_13 = arith.constant 0 : index
      %13 = vector.load %arg5[%c0_12, %c0_13] : memref<128x128xf32, #tpu.memory_space<vmem>>, vector<128x128xf32>
      %14 = arith.addf %12, %13 : vector<128x128xf32>
      %cst_14 = arith.constant 0.000000e+00 : f32
      %15 = vector.broadcast %cst_14 : f32 to vector<128x128xf32>
      %16 = arith.maximumf %14, %15 : vector<128x128xf32>
      %c0_15 = arith.constant 0 : index
      %c0_16 = arith.constant 0 : index
      %17 = vector.load %arg6[%c0_15, %c0_16] : memref<128x128xf32, #tpu.memory_space<vmem>>, vector<128x128xf32>
      tpu.vector_store %arg6[%c0_15, %c0_16], %16 {strides = array<i32>} : memref<128x128xf32, #tpu.memory_space<vmem>>, vector<128x128xf32>,
    } else {
    }
    return
  }
  func.func @transform_0(%arg0: i32, %arg1: i32) -> (i32, i32) {
    %c0_i32 = arith.constant 0 : i32
    return %arg0, %arg1 : i32, i32
  }
  func.func @transform_1(%arg0: i32, %arg1: i32) -> (i32, i32) {
    %c0_i32 = arith.constant 0 : i32
    %c0_i32_0 = arith.constant 0 : i32
    return %arg1, %c0_i32 : i32, i32
  }
  func.func @transform_2(%arg0: i32, %arg1: i32) -> (i32, i32) {
    %c0_i32 = arith.constant 0 : i32
    %c0_i32_0 = arith.constant 0 : i32
    %c0_i32_1 = arith.constant 0 : i32
    return %c0_i32, %c0_i32_0 : i32, i32
  }
  func.func @transform_3(%arg0: i32, %arg1: i32) -> (i32, i32) {
    %c0_i32 = arith.constant 0 : i32
    %c0_i32_0 = arith.constant 0 : i32
    return %arg0, %c0_i32 : i32, i32
  }
  func.func @transform_4(%arg0: i32, %arg1: i32) -> (i32, i32) {
    %c0_i32 = arith.constant 0 : i32
    %c0_i32_0 = arith.constant 0 : i32
    return %arg0, %c0_i32 : i32, i32
  }
}

</mosaic_0001>

<bundles_post_ra>
// kernel: bottleneck_forward.3
= control target key start
LH: loop header
LB: loop body
LE: loop exit
PB: predicated region body
PF: predicated region fallthrough
CT: control target
= control target key end

     0   :  { %s581_s1 = inlined_call_operand.vmem [shape: bf16[128,128], index: 1, kind: input, shape index: {}]   ;;  %s582_s2 = inlined_call_operand.vmem [shape: f32[1,128], index: 2, kind: input, shape index: {}]   ;;  %s583_s0 = inlined_call_operand.vmem [shape: bf16[128,128], index: 0, kind: input, shape index: {}]   ;;  %s584_s3 = inlined_call_operand.vmem [shape: bf16[128,128], index: 3, kind: output, shape index: {}]  }
   0x1   :  { %v413_v0 = vld [vmem:[%s581_s1 + $0x38] sm:$0xff]  ;;  %v412_v1 = vld [vmem:[%s581_s1 + $0x30] sm:$0xff]  ;;  %v411_v2 = vld [vmem:[%s581_s1 + $0x28] sm:$0xff] }
   0x2   :  { %182 = vmatpush.bf16.msra.mxu0 %v413_v0  ;;  %461 = vmatpush.bf16.msra.mxu1 %v413_v0  ;;  %v410_v3 = vld [vmem:[%s581_s1 + $0x20] sm:$0xff]  ;;  %v409_v4 = vld [vmem:[%s581_s1 + $0x18] sm:$0xff]  ;;  %v408_v5 = vld [vmem:[%s581_s1 + $0x10] sm:$0xff] }
   0x3   :  { %462 = vmatpush.bf16.msra.mxu2 %v413_v0  ;;  %463 = vmatpush.bf16.msra.mxu3 %v413_v0  ;;  %v407_v6 = vld [vmem:[%s581_s1 + $0x8] sm:$0xff]  ;;  %v406_v7 = vld [vmem:[%s581_s1] sm:$0xff]  ;;  %v400_v9 = vld [vmem:[%s583_s0 + $0x10] sm:$0xff] }
   0x4   :  { %v398_v8 = vld [vmem:[%s583_s0] sm:$0xff]  ;;  %v404_v11 = vld [vmem:[%s583_s0 + $0x30] sm:$0xff]  ;;  %v399_v12 = vld [vmem:[%s583_s0 + $0x8] sm:$0xff] }
   0x5   :  { %v402_v10 = vld [vmem:[%s583_s0 + $0x20] sm:$0xff]  ;;  %v401_v13 = vld [vmem:[%s583_s0 + $0x18] sm:$0xff]  ;;  %v403_v14 = vld [vmem:[%s583_s0 + $0x28] sm:$0xff] }
   0x6   :  { %183 = vmatpush.bf16.msra.mxu0 %v412_v1  ;;  %464 = vmatpush.bf16.msra.mxu1 %v412_v1  ;;  %v405_v15 = vld [vmem:[%s583_s0 + $0x38] sm:$0xff]  ;;  %v485_v18 = vld [vmem:[%s582_s2] ss:$0 sm:$0xff] }
   0x7   :  { %465 = vmatpush.bf16.msra.mxu2 %v412_v1  ;;  %466 = vmatpush.bf16.msra.mxu3 %v412_v1 }
   0xa   :  { %184 = vmatpush.bf16.msra.mxu0 %v411_v2  ;;  %467 = vmatpush.bf16.msra.mxu1 %v411_v2 }
   0xb   :  { %468 = vmatpush.bf16.msra.mxu2 %v411_v2  ;;  %469 = vmatpush.bf16.msra.mxu3 %v411_v2 }
   0xe   :  { %185 = vmatpush.bf16.msra.mxu0 %v410_v3  ;;  %470 = vmatpush.bf16.msra.mxu1 %v410_v3 }
   0xf   :  { %471 = vmatpush.bf16.msra.mxu2 %v410_v3  ;;  %472 = vmatpush.bf16.msra.mxu3 %v410_v3 }
  0x12   :  { %186 = vmatpush.bf16.msra.mxu0 %v409_v4  ;;  %473 = vmatpush.bf16.msra.mxu1 %v409_v4 }
  0x13   :  { %474 = vmatpush.bf16.msra.mxu2 %v409_v4  ;;  %475 = vmatpush.bf16.msra.mxu3 %v409_v4 }
  0x16   :  { %187 = vmatpush.bf16.msra.mxu0 %v408_v5  ;;  %476 = vmatpush.bf16.msra.mxu1 %v408_v5 }
  0x17   :  { %477 = vmatpush.bf16.msra.mxu2 %v408_v5  ;;  %478 = vmatpush.bf16.msra.mxu3 %v408_v5 }
  0x1a   :  { %188 = vmatpush.bf16.msra.mxu0 %v407_v6  ;;  %479 = vmatpush.bf16.msra.mxu1 %v407_v6 }
  0x1b   :  { %480 = vmatpush.bf16.msra.mxu2 %v407_v6  ;;  %481 = vmatpush.bf16.msra.mxu3 %v407_v6 }
  0x1e   :  { %189 = vmatpush.bf16.msra.mxu0 %v406_v7  ;;  %482 = vmatpush.bf16.msra.mxu1 %v406_v7 }
  0x1f   :  { %483 = vmatpush.bf16.msra.mxu2 %v406_v7  ;;  %484 = vmatpush.bf16.msra.mxu3 %v406_v7 }
  0x21   :  { %190 = vmatmul.bf16.vlgmr.msra.gmra.mxu0 %v398_v8  ;;  %200 = vmatmul.bf16.vlgmr.msra.gmra.mxu1 %v400_v9 }
  0x22   :  { %210 = vmatmul.bf16.vlgmr.msra.gmra.mxu2 %v402_v10  ;;  %220 = vmatmul.bf16.vlgmr.msra.gmra.mxu3 %v404_v11 }
  0x31   :  { %195 = vmatmul.bf16.gmra.mxu0 %v399_v12  ;;  %205 = vmatmul.bf16.gmra.mxu1 %v401_v13 }
  0x32   :  { %215 = vmatmul.bf16.gmra.mxu2 %v403_v14  ;;  %225 = vmatmul.bf16.gmra.mxu3 %v405_v15 }
  0x9e   :  { %v191_v16 = vpop.f32.mrf.mxu0  ;;  %v201_v17 = vpop.f32.mrf.mxu1 }
  0x9f   :  { %v231_v19 = vadd.f32 %v485_v18, %v191_v16  ;;  %v235_v20 = vadd.f32 %v485_v18, %v201_v17 }
  0xa1   :  { %v282_v27 = vmax.f32 %v231_v19, 0.0  ;;  %v286_v28 = vmax.f32 %v235_v20, 0.0 }
  0xa5   :  { %v211_v21 = vpop.f32.mrf.mxu2  ;;  %v221_v22 = vpop.f32.mrf.mxu3 }
  0xa6   :  { %v193_v23 = vpop.f32.mrf.mxu0  ;;  %v203_v24 = vpop.f32.mrf.mxu1  ;;  %v239_v33 = vadd.f32 %v485_v18, %v211_v21  ;;  %v243_v34 = vadd.f32 %v485_v18, %v221_v22 }
  0xa7   :  { %v232_v25 = vadd.f32 %v485_v18, %v193_v23  ;;  %v236_v26 = vadd.f32 %v485_v18, %v203_v24 }
  0xa8   :  { %v290_v41 = vmax.f32 %v239_v33, 0.0  ;;  %v294_v42 = vmax.f32 %v243_v34, 0.0 }
  0xa9   :  { %v283_v29 = vmax.f32 %v232_v25, 0.0  ;;  %v287_v30 = vmax.f32 %v236_v26, 0.0 }
  0xab   :  { %v417_v31 = vpack.c.bf16 %v283_v29, %v282_v27  ;;  %v427_v32 = vpack.c.bf16 %v287_v30, %v286_v28 }
  0xad   :  { %418 = vst [vmem:[%s584_s3] sm:$0xff] %v417_v31   ;;  %v213_v35 = vpop.f32.mrf.mxu2  ;;  %v223_v36 = vpop.f32.mrf.mxu3 }
  0xae   :  { %455 = vst [vmem:[%s584_s3 + $0x10] sm:$0xff] %v427_v32   ;;  %v240_v37 = vadd.f32 %v485_v18, %v213_v35  ;;  %v244_v38 = vadd.f32 %v485_v18, %v223_v36  ;;  %v196_v39 = vpop.f32.mrf.mxu0  ;;  %v206_v40 = vpop.f32.mrf.mxu1 }
  0xaf   :  { %v233_v47 = vadd.f32 %v485_v18, %v196_v39  ;;  %v237_v48 = vadd.f32 %v485_v18, %v206_v40 }
  0xb0   :  { %v291_v43 = vmax.f32 %v240_v37, 0.0  ;;  %v295_v44 = vmax.f32 %v244_v38, 0.0 }
  0xb1   :  { %v284_v55 = vmax.f32 %v233_v47, 0.0  ;;  %v288_v56 = vmax.f32 %v237_v48, 0.0 }
  0xb2   :  { %v437_v45 = vpack.c.bf16 %v291_v43, %v290_v41  ;;  %v447_v46 = vpack.c.bf16 %v295_v44, %v294_v42 }
  0xb4   :  { %457 = vst [vmem:[%s584_s3 + $0x20] sm:$0xff] %v437_v45  }
  0xb5   :  { %459 = vst [vmem:[%s584_s3 + $0x30] sm:$0xff] %v447_v46   ;;  %v216_v49 = vpop.f32.mrf.mxu2  ;;  %v226_v50 = vpop.f32.mrf.mxu3 }
  0xb6   :  { %v198_v51 = vpop.f32.mrf.mxu0  ;;  %v208_v52 = vpop.f32.mrf.mxu1  ;;  %v241_v61 = vadd.f32 %v485_v18, %v216_v49  ;;  %v245_v62 = vadd.f32 %v485_v18, %v226_v50 }
  0xb7   :  { %v234_v53 = vadd.f32 %v485_v18, %v198_v51  ;;  %v238_v54 = vadd.f32 %v485_v18, %v208_v52 }
  0xb8   :  { %v292_v3 = vmax.f32 %v241_v61, 0.0  ;;  %v296_v4 = vmax.f32 %v245_v62, 0.0 }
  0xb9   :  { %v285_v57 = vmax.f32 %v234_v53, 0.0  ;;  %v289_v58 = vmax.f32 %v238_v54, 0.0 }
  0xbb   :  { %v422_v59 = vpack.c.bf16 %v285_v57, %v284_v55  ;;  %v432_v60 = vpack.c.bf16 %v289_v58, %v288_v56 }
  0xbd   :  { %454 = vst [vmem:[%s584_s3 + $0x8] sm:$0xff] %v422_v59   ;;  %v218_v63 = vpop.f32.mrf.mxu2  ;;  %v228_v0 = vpop.f32.mrf.mxu3 }
  0xbe   :  { %456 = vst [vmem:[%s584_s3 + $0x18] sm:$0xff] %v432_v60   ;;  %v242_v1 = vadd.f32 %v485_v18, %v218_v63  ;;  %v246_v2 = vadd.f32 %v485_v18, %v228_v0 }
  0xc0   :  { %v293_v5 = vmax.f32 %v242_v1, 0.0  ;;  %v297_v6 = vmax.f32 %v246_v2, 0.0 }
  0xc2   :  { %v442_v7 = vpack.c.bf16 %v293_v5, %v292_v3  ;;  %v452_v8 = vpack.c.bf16 %v297_v6, %v296_v4 }
  0xc4   :  { %458 = vst [vmem:[%s584_s3 + $0x28] sm:$0xff] %v442_v7  }
  0xc5   :  { %460 = vst [vmem:[%s584_s3 + $0x38] sm:$0xff] %v452_v8  }

// kernel: bottleneck_forward.4
= control target key start
LH: loop header
LB: loop body
LE: loop exit
PB: predicated region body
PF: predicated region fallthrough
CT: control target
= control target key end

     0   :  { %s1490_s12 = smov 0   ;;  %s1492_s13 = smov 0   ;;  %s1780_s0 = inlined_call_operand.vmem [shape: bf16[128,1152], index: 0, kind: input, shape index: {}]   ;;  %s1781_s1 = inlined_call_operand.vmem [shape: bf16[1152,128], index: 1, kind: input, shape index: {}]   ;;  %s1782_s2 = inlined_call_operand.vmem [shape: f32[1,128], index: 2, kind: input, shape index: {}]   ;;  %s1783_s3 = inlined_call_operand.vmem [shape: bf16[128,128], index: 3, kind: output, shape index: {}]  }
   0x1   :  { %s1494_s14 = smov 0   ;;  %s1496_s15 = smov 0  }
   0x2   :  { %s1498_s16 = smov 0  }
   0x3 LB: > { %s22_s17 = sadd.s32 1, %s1464_s15  ;;  %p41_p1 = scmp.ne.s32.totalorder %s1456_s13, %s1452_s12  ;;  %s1468_s16 = sphi %s1498_s16, %s13_s16   ;;  %s1464_s15 = sphi %s1496_s15, %s1787_s15   ;;  %s1460_s14 = sphi %s1494_s14, %s1786_s14   ;;  %s1456_s13 = sphi %s1492_s13, %s1785_s13   ;;  %s1452_s12 = sphi %s1490_s12, %s1784_s12  }
   0x4   : > { %p23_p0 = scmp.ge.s32.totalorder %s22_s17, 3  ;;  %p42_p2 = scmp.eq.s32.totalorder %s1468_s16, 0 }
   0x5   : > { %s34_s19 = sadd.s32 1, %s1456_s13  ;;  %p1033_p5 = scmp.ge.s32.totalorder %s1468_s16, 3 }
   0x6   : > { %s1789_s17 = smov (%p23_p0, %s22_s17), 0  ;;  %p43_p3 = por %p42_p2, %p41_p1 }
   0x7   : > { %s30_s18 = ssub.s32 %s1464_s15, %s1789_s17  ;;  %143 = sbr.rel (%p1033_p5) target bundleno = 49 (0x31), region = 20 }
   0x8   : > { %p32_p4 = scmp.eq.s32.totalorder %s30_s18, 0 }
   0xa   : > { %s1525_s20 = scalar_select %p32_p4, %s1456_s13, %s34_s19  }
   0xc   : > { %146 = sbr.rel (!%p43_p3) target bundleno = 49 (0x31), region = 24  ;;  %s148_s21 = sand.u32 (%p43_p3), 1, %s1456_s13  }
   0xd   : > { %s1267_s22 = smul.u32 (%p43_p3), 12, %s1464_s15 }
   0xe   : > { %s1387_s23 = smul.u32 (%p43_p3), 192, %s148_s21 }
   0xf   : > { %s1533_s26 = scalar_lea.vmem (%p43_p3), %s1780_s0, %s1267_s22 }
  0x10   : > { %v171_v0 = vld [vmem:[%s1533_s26] sm:$0xff] (%p43_p3)  ;;  %v175_v2 = vld [vmem:[%s1533_s26 + $0x48] sm:$0xff] (%p43_p3)  ;;  %s1538_s27 = scalar_lea.vmem (%p43_p3), [#allocation3], %s1387_s23  ;;  %v179_v4 = vld [vmem:[%s1533_s26 + $0x90] sm:$0xff] (%p43_p3) }
  0x11   : > { %v173_v1 = vld [vmem:[%s1533_s26 + $0x24] sm:$0xff]  ;;  %172 = vst [vmem:[%s1538_s27] sm:$0xff] %v171_v0  ;;  %v177_v3 = vld [vmem:[%s1533_s26 + $0x6c] sm:$0xff]  ;;  %v181_v5 = vld [vmem:[%s1533_s26 + $0xb4] sm:$0xff] }
  0x12   : > { %174 = vst [vmem:[%s1538_s27 + $0xc] sm:$0xff] %v173_v1  ;;  %v183_v6 = vld [vmem:[%s1533_s26 + $0xd8] sm:$0xff]  ;;  %v187_v8 = vld [vmem:[%s1533_s26 + $0x120] sm:$0xff]  ;;  %v191_v10 = vld [vmem:[%s1533_s26 + $0x168] sm:$0xff] }
  0x13   : > { %176 = vst [vmem:[%s1538_s27 + $0x18] sm:$0xff] %v175_v2  ;;  %v185_v7 = vld [vmem:[%s1533_s26 + $0xfc] sm:$0xff]  ;;  %v189_v9 = vld [vmem:[%s1533_s26 + $0x144] sm:$0xff]  ;;  %v193_v11 = vld [vmem:[%s1533_s26 + $0x18c] sm:$0xff] }
  0x14   : > { %178 = vst [vmem:[%s1538_s27 + $0x24] sm:$0xff] %v177_v3  ;;  %v195_v12 = vld [vmem:[%s1533_s26 + $0x1b0] sm:$0xff]  ;;  %v199_v14 = vld [vmem:[%s1533_s26 + $0x1f8] sm:$0xff]  ;;  %v1035_v16 = vld [vmem:[%s1533_s26 + $0x8] sm:$0xf] }
  0x15   : > { %180 = vst [vmem:[%s1538_s27 + $0x30] sm:$0xff] %v179_v4  ;;  %v197_v13 = vld [vmem:[%s1533_s26 + $0x1d4] sm:$0xff]  ;;  %v201_v15 = vld [vmem:[%s1533_s26 + $0x21c] sm:$0xff]  ;;  %v1037_v17 = vld [vmem:[%s1533_s26 + $0x2c] sm:$0xf] }
  0x16   : > { %182 = vst [vmem:[%s1538_s27 + $0x3c] sm:$0xff] %v181_v5  ;;  %v1039_v18 = vld [vmem:[%s1533_s26 + $0x50] sm:$0xf]  ;;  %v1041_v19 = vld [vmem:[%s1533_s26 + $0x74] sm:$0xf] }
  0x17   : > { %184 = vst [vmem:[%s1538_s27 + $0x48] sm:$0xff] %v183_v6  ;;  %v1043_v20 = vld [vmem:[%s1533_s26 + $0x98] sm:$0xf]  ;;  %v1045_v21 = vld [vmem:[%s1533_s26 + $0xbc] sm:$0xf] }
  0x18   : > { %186 = vst [vmem:[%s1538_s27 + $0x54] sm:$0xff] %v185_v7  ;;  %v1047_v22 = vld [vmem:[%s1533_s26 + $0xe0] sm:$0xf]  ;;  %v1049_v23 = vld [vmem:[%s1533_s26 + $0x104] sm:$0xf] }
  0x19   : > { %188 = vst [vmem:[%s1538_s27 + $0x60] sm:$0xff] %v187_v8  ;;  %v1051_v24 = vld [vmem:[%s1533_s26 + $0x128] sm:$0xf]  ;;  %v1053_v25 = vld [vmem:[%s1533_s26 + $0x14c] sm:$0xf] }
  0x1a   : > { %190 = vst [vmem:[%s1538_s27 + $0x6c] sm:$0xff] %v189_v9  ;;  %v1055_v26 = vld [vmem:[%s1533_s26 + $0x170] sm:$0xf]  ;;  %v1057_v27 = vld [vmem:[%s1533_s26 + $0x194] sm:$0xf] }
  0x1b   : > { %192 = vst [vmem:[%s1538_s27 + $0x78] sm:$0xff] %v191_v10  ;;  %v1059_v28 = vld [vmem:[%s1533_s26 + $0x1b8] sm:$0xf]  ;;  %v1061_v29 = vld [vmem:[%s1533_s26 + $0x1dc] sm:$0xf] }
  0x1c   : > { %194 = vst [vmem:[%s1538_s27 + $0x84] sm:$0xff] %v193_v11  ;;  %v1063_v30 = vld [vmem:[%s1533_s26 + $0x200] sm:$0xf]  ;;  %v1065_v31 = vld [vmem:[%s1533_s26 + $0x224] sm:$0xf] }
  0x1d   : > { %196 = vst [vmem:[%s1538_s27 + $0x90] sm:$0xff] %v195_v12 }
  0x1e   : > { %198 = vst [vmem:[%s1538_s27 + $0x9c] sm:$0xff] %v197_v13 }
  0x1f   : > { %200 = vst [vmem:[%s1538_s27 + $0xa8] sm:$0xff] %v199_v14 }
  0x20   : > { %202 = vst [vmem:[%s1538_s27 + $0xb4] sm:$0xff] %v201_v15 }
  0x21   : > { %1036 = vst [vmem:[%s1538_s27 + $0x8] sm:$0xf] %v1035_v16 }
  0x22   : > { %1038 = vst [vmem:[%s1538_s27 + $0x14] sm:$0xf] %v1037_v17 }
  0x23   : > { %1040 = vst [vmem:[%s1538_s27 + $0x20] sm:$0xf] %v1039_v18 }
  0x24   : > { %1042 = vst [vmem:[%s1538_s27 + $0x2c] sm:$0xf] %v1041_v19 }
  0x25   : > { %1044 = vst [vmem:[%s1538_s27 + $0x38] sm:$0xf] %v1043_v20 }
  0x26   : > { %1046 = vst [vmem:[%s1538_s27 + $0x44] sm:$0xf] %v1045_v21 }
  0x27   : > { %1048 = vst [vmem:[%s1538_s27 + $0x50] sm:$0xf] %v1047_v22 }
  0x28   : > { %1050 = vst [vmem:[%s1538_s27 + $0x5c] sm:$0xf] %v1049_v23 }
  0x29   : > { %1052 = vst [vmem:[%s1538_s27 + $0x68] sm:$0xf] %v1051_v24 }
  0x2a   : > { %1054 = vst [vmem:[%s1538_s27 + $0x74] sm:$0xf] %v1053_v25 }
  0x2b   : > { %1056 = vst [vmem:[%s1538_s27 + $0x80] sm:$0xf] %v1055_v26 }
  0x2c   : > { %1058 = vst [vmem:[%s1538_s27 + $0x8c] sm:$0xf] %v1057_v27 }
  0x2d   : > { %1060 = vst [vmem:[%s1538_s27 + $0x98] sm:$0xf] %v1059_v28 }
  0x2e   : > { %1062 = vst [vmem:[%s1538_s27 + $0xa4] sm:$0xf] %v1061_v29 }
  0x2f   : > { %1064 = vst [vmem:[%s1538_s27 + $0xb0] sm:$0xf] %v1063_v30 }
  0x30   : > { %1066 = vst [vmem:[%s1538_s27 + $0xbc] sm:$0xf] %v1065_v31 }
  0x31 PF: > { %p1067_p6 = scmp.ge.s32.totalorder %s1468_s16, 1  ;;  %p256_p7 = scmp.lt.s32.totalorder %s1468_s16, 4 }
  0x33   : > { %p257_p8 = pnand %p1067_p6, %p256_p7 }
  0x34   : > { %s263_s28 = sand.u32 (!%p257_p8), 1, %s1452_s12   ;;  %s293_s29 = smul.u32 (!%p257_p8), 48, %s1460_s14 }
  0x35   : > { %260 = sbr.rel (%p257_p8) target bundleno = 352 (0x160), region = 54  ;;  %p1069_p10 = scmp.ne.s32.totalorder (!%p257_p8), %s1460_s14, 0 }
  0x36   : > { %s1388_s30 = smul.u32 (!%p257_p8), 192, %s263_s28  ;;  %p294_p9 = scmp.lt.s32.totalorder (!%p257_p8), %s293_s29, 143 }
  0x38   : > { %s1610_s8 = scalar_lea.vmem (!%p257_p8), [#allocation3], %s1388_s30 }
  0x3a   : > { %s1791_s29 = smov (!%p294_p9, %s293_s29), 143  ;;  %308 = sbr.rel (%p1069_p10) target bundleno = 80 (0x50), region = 62 }
  0x3b   : > { %s1068_s4 = sshll.u32 %s1791_s29, 2 }
  0x3c   : > { %s1608_s7 = scalar_lea.vmem %s1781_s1, %s1068_s4 }
  0x3f   : > { %v1429_v32 = vld [vmem:[%s1782_s2] ss:$0 sm:$0xff] }
  0x40   : > { %313 = vst [vmem:[#allocation2 + $0x30] sm:$0xff] %v1429_v32 }
  0x41   : > { %314 = vst [vmem:[#allocation2] sm:$0xff] %v1429_v32 }
  0x42   : > { %315 = vst [vmem:[#allocation2 + $0x58] sm:$0xff] %v1429_v32 }
  0x43   : > { %316 = vst [vmem:[#allocation2 + $0x18] sm:$0xff] %v1429_v32 }
  0x44   : > { %317 = vst [vmem:[#allocation2 + $0x50] sm:$0xff] %v1429_v32 }
  0x45   : > { %318 = vst [vmem:[#allocation2 + $0x68] sm:$0xff] %v1429_v32 }
  0x46   : > { %319 = vst [vmem:[#allocation2 + $0x8] sm:$0xff] %v1429_v32 }
  0x47   : > { %320 = vst [vmem:[#allocation2 + $0x48] sm:$0xff] %v1429_v32 }
  0x48   : > { %321 = vst [vmem:[#allocation2 + $0x40] sm:$0xff] %v1429_v32 }
  0x49   : > { %322 = vst [vmem:[#allocation2 + $0x20] sm:$0xff] %v1429_v32 }
  0x4a   : > { %323 = vst [vmem:[#allocation2 + $0x10] sm:$0xff] %v1429_v32 }
  0x4b   : > { %324 = vst [vmem:[#allocation2 + $0x38] sm:$0xff] %v1429_v32 }
  0x4c   : > { %325 = vst [vmem:[#allocation2 + $0x60] sm:$0xff] %v1429_v32 }
  0x4d   : > { %326 = vst [vmem:[#allocation2 + $0x70] sm:$0xff] %v1429_v32 }
  0x4e   : > { %327 = vst [vmem:[#allocation2 + $0x78] sm:$0xff] %v1429_v32 }
  0x4f   : > { %328 = vst [vmem:[#allocation2 + $0x28] sm:$0xff] %v1429_v32 }
  0x50 PF: > { %v1299_v33 = vld [vmem:[%s1608_s7 + $0x38] sm:$0xff]  ;;  %v1298_v36 = vld [vmem:[%s1608_s7 + $0x30] sm:$0xff]  ;;  %v1297_v39 = vld [vmem:[%s1608_s7 + $0x28] sm:$0xff]  ;;  %p1262_p11 = scmp.ne.s32.totalorder %s1460_s14, 2 }
  0x51   : > { %v1618_v34 = vld [vmem:[%s1608_s7 + $0x78] sm:$0xff]  ;;  %697 = vmatpush.bf16.msra.mxu0 %v1299_v33  ;;  %1363 = vmatpush.bf16.msra.mxu3 %v1299_v33  ;;  %v1627_v37 = vld [vmem:[%s1608_s7 + $0x70] sm:$0xff]  ;;  %v1305_v40 = vld [vmem:[%s1608_s7 + $0x68] sm:$0xff] }
  0x52   : > { %v1621_v35 = vld [vmem:[%s1608_s7 + $0xb8] sm:$0xff]  ;;  %746 = vmatpush.bf16.msra.mxu1 %v1618_v34  ;;  %v1630_v38 = vld [vmem:[%s1608_s7 + $0xb0] sm:$0xff]  ;;  %v1637_v41 = vld [vmem:[%s1608_s7 + $0xa8] sm:$0xff] }
  0x53   : > { %795 = vmatpush.bf16.msra.mxu2 %v1621_v35  ;;  %v1296_v42 = vld [vmem:[%s1608_s7 + $0x20] sm:$0xff]  ;;  %v1295_v45 = vld [vmem:[%s1608_s7 + $0x18] sm:$0xff]  ;;  %v1294_v48 = vld [vmem:[%s1608_s7 + $0x10] sm:$0xff] }
  0x54   : > { %v1304_v43 = vld [vmem:[%s1608_s7 + $0x60] sm:$0xff]  ;;  %v1303_v46 = vld [vmem:[%s1608_s7 + $0x58] sm:$0xff]  ;;  %v1302_v49 = vld [vmem:[%s1608_s7 + $0x50] sm:$0xff] }
  0x55   : > { %698 = vmatpush.bf16.msra.mxu0 %v1298_v36  ;;  %1364 = vmatpush.bf16.msra.mxu3 %v1298_v36  ;;  %v1643_v44 = vld [vmem:[%s1608_s7 + $0xa0] sm:$0xff]  ;;  %v1649_v47 = vld [vmem:[%s1608_s7 + $0x98] sm:$0xff]  ;;  %v1655_v50 = vld [vmem:[%s1608_s7 + $0x90] sm:$0xff] }
  0x56   : > { %747 = vmatpush.bf16.msra.mxu1 %v1627_v37  ;;  %v1293_v51 = vld [vmem:[%s1608_s7 + $0x8] sm:$0xff]  ;;  %v1292_v54 = vld [vmem:[%s1608_s7] sm:$0xff]  ;;  %v1144_v59 = vld [vmem:[%s1610_s8 + $0x90] sm:$0xf] }
  0x57   : > { %796 = vmatpush.bf16.msra.mxu2 %v1630_v38  ;;  %v1301_v52 = vld [vmem:[%s1608_s7 + $0x48] sm:$0xff]  ;;  %v1300_v55 = vld [vmem:[%s1608_s7 + $0x40] sm:$0xff]  ;;  %v1287_v60 = vld [vmem:[%s1610_s8 + $0x98] sm:$0xf0] }
  0x58   : > { %v1661_v53 = vld [vmem:[%s1608_s7 + $0x88] sm:$0xff]  ;;  %v1666_v56 = vld [vmem:[%s1608_s7 + $0x80] sm:$0xff]  ;;  %v1074_v62 = vld [vmem:[%s1610_s8 + $0xc] sm:$0xf0]  ;;  %v1145_v2 = vor.u32 %v1287_v60, %v1144_v59 }
  0x59   : > { %699 = vmatpush.bf16.msra.mxu0 %v1297_v39  ;;  %1365 = vmatpush.bf16.msra.mxu3 %v1297_v39  ;;  %v1072_v57 = vld [vmem:[%s1610_s8] sm:$0xf]  ;;  %v1269_v58 = vld [vmem:[%s1610_s8 + $0x8] sm:$0xf0]  ;;  %v1268_v61 = vld [vmem:[%s1610_s8 + $0x4] sm:$0xf] }
  0x5a   : > { %748 = vmatpush.bf16.msra.mxu1 %v1305_v40  ;;  %v1080_v63 = vld [vmem:[%s1610_s8 + $0x8] sm:$0xf]  ;;  %v1270_v0 = vld [vmem:[%s1610_s8 + $0x10] sm:$0xf0]  ;;  %v1073_v1 = vor.u32 %v1269_v58, %v1072_v57  ;;  %v1077_v3 = vor.u32 %v1268_v61, %v1074_v62  ;;  %v1084_v5 = vld [vmem:[%s1610_s8 + $0x18] sm:$0xf] }
  0x5b   : > { %797 = vmatpush.bf16.msra.mxu2 %v1637_v41  ;;  %v1081_v4 = vor.u32 %v1270_v0, %v1080_v63  ;;  %v1272_v6 = vld [vmem:[%s1610_s8 + $0x20] sm:$0xf0]  ;;  %v1156_v7 = vld [vmem:[%s1610_s8 + $0xa8] sm:$0xf]  ;;  %v1290_v8 = vld [vmem:[%s1610_s8 + $0xb0] sm:$0xf0] }
  0x5c   : > { %v1271_v9 = vld [vmem:[%s1610_s8 + $0x1c] sm:$0xf]  ;;  %v1086_v10 = vld [vmem:[%s1610_s8 + $0x24] sm:$0xf0]  ;;  %v1092_v11 = vld [vmem:[%s1610_s8 + $0x20] sm:$0xf]  ;;  %v1085_v13 = vor.u32 %v1272_v6, %v1084_v5  ;;  %v1157_v14 = vor.u32 %v1290_v8, %v1156_v7 }
  0x5d   : > { %700 = vmatpush.bf16.msra.mxu0 %v1296_v42  ;;  %1366 = vmatpush.bf16.msra.mxu3 %v1296_v42  ;;  %v1273_v12 = vld [vmem:[%s1610_s8 + $0x28] sm:$0xf0]  ;;  %v1089_v15 = vor.u32 %v1271_v9, %v1086_v10  ;;  %v1096_v17 = vld [vmem:[%s1610_s8 + $0x30] sm:$0xf]  ;;  %v1275_v18 = vld [vmem:[%s1610_s8 + $0x38] sm:$0xf0] }
  0x5e   : > { %749 = vmatpush.bf16.msra.mxu1 %v1304_v43  ;;  %v1093_v16 = vor.u32 %v1273_v12, %v1092_v11  ;;  %v1274_v19 = vld [vmem:[%s1610_s8 + $0x34] sm:$0xf]  ;;  %v1146_v21 = vld [vmem:[%s1610_s8 + $0x9c] sm:$0xf0]  ;;  %v1104_v23 = vld [vmem:[%s1610_s8 + $0x38] sm:$0xf]  ;;  %v1097_v25 = vor.u32 %v1275_v18, %v1096_v17 }
  0x5f   : > { %798 = vmatpush.bf16.msra.mxu2 %v1643_v44  ;;  %v1286_v20 = vld [vmem:[%s1610_s8 + $0x94] sm:$0xf]  ;;  %v1098_v22 = vld [vmem:[%s1610_s8 + $0x3c] sm:$0xf0]  ;;  %v1276_v24 = vld [vmem:[%s1610_s8 + $0x40] sm:$0xf0] }
  0x60   : > { %v1149_v26 = vor.u32 %v1286_v20, %v1146_v21  ;;  %v1101_v27 = vor.u32 %v1274_v19, %v1098_v22  ;;  %v1105_v28 = vor.u32 %v1276_v24, %v1104_v23  ;;  %v1108_v29 = vld [vmem:[%s1610_s8 + $0x48] sm:$0xf]  ;;  %v1278_v30 = vld [vmem:[%s1610_s8 + $0x50] sm:$0xf0]  ;;  %v1277_v31 = vld [vmem:[%s1610_s8 + $0x4c] sm:$0xf] }
  0x61   : > { %701 = vmatpush.bf16.msra.mxu0 %v1295_v45  ;;  %1367 = vmatpush.bf16.msra.mxu3 %v1295_v45  ;;  %v1289_v32 = vld [vmem:[%s1610_s8 + $0xac] sm:$0xf]  ;;  %v1158_v33 = vld [vmem:[%s1610_s8 + $0xb4] sm:$0xf0]  ;;  %v1279_v36 = vld [vmem:[%s1610_s8 + $0x58] sm:$0xf0] }
  0x62   : > { %750 = vmatpush.bf16.msra.mxu1 %v1303_v46  ;;  %v1161_v39 = vor.u32 %v1289_v32, %v1158_v33  ;;  %v1281_v42 = vld [vmem:[%s1610_s8 + $0x68] sm:$0xf0]  ;;  %v1288_v45 = vld [vmem:[%s1610_s8 + $0xa0] sm:$0xf0]  ;;  %v1164_v57 = vld [vmem:[%s1610_s8 + $0xb0] sm:$0xf] }
  0x63   : > { %799 = vmatpush.bf16.msra.mxu2 %v1649_v47  ;;  %v1134_v58 = vld [vmem:[%s1610_s8 + $0x84] sm:$0xf0]  ;;  %v1140_v59 = vld [vmem:[%s1610_s8 + $0x80] sm:$0xf]  ;;  %v1285_v60 = vld [vmem:[%s1610_s8 + $0x88] sm:$0xf0] }
  0x64   : > { %v1141_v0 = vor.u32 %v1285_v60, %v1140_v59  ;;  %v329_v5 = vld [vmem:[#allocation2 + $0x30] sm:$0xff]  ;;  %v331_v21 = vld [vmem:[#allocation2 + $0x58] sm:$0xff] }
  0x65   : > { %702 = vmatpush.bf16.msra.mxu0 %v1294_v48  ;;  %1368 = vmatpush.bf16.msra.mxu3 %v1294_v48  ;;  %v1282_v48 = vld [vmem:[%s1610_s8 + $0x70] sm:$0xf0] }
  0x66   : > { %751 = vmatpush.bf16.msra.mxu1 %v1302_v49 }
  0x67   : > { %800 = vmatpush.bf16.msra.mxu2 %v1655_v50 }
  0x69   : > { %703 = vmatpush.bf16.msra.mxu0 %v1293_v51  ;;  %1369 = vmatpush.bf16.msra.mxu3 %v1293_v51 }
  0x6a   : > { %752 = vmatpush.bf16.msra.mxu1 %v1301_v52 }
  0x6b   : > { %801 = vmatpush.bf16.msra.mxu2 %v1661_v53 }
  0x6d   : > { %704 = vmatpush.bf16.msra.mxu0 %v1292_v54  ;;  %1370 = vmatpush.bf16.msra.mxu3 %v1292_v54  ;;  %v1284_v54 = vld [vmem:[%s1610_s8 + $0x80] sm:$0xf0] }
  0x6e   : > { %753 = vmatpush.bf16.msra.mxu1 %v1300_v55 }
  0x6f   : > { %802 = vmatpush.bf16.msra.mxu2 %v1666_v56 }
  0x70   : > { %705 = vmatmul.bf16.vlgmr.msra.gmra.mxu0 %v1073_v1  ;;  %735 = vmatmul.bf16.vlgmr.msra.gmra.mxu3 %v1145_v2 }
  0x71   : > { %1371 = vmatpush.bf16.msrb.mxu3 %v1618_v34  ;;  %754 = vmatmul.bf16.vlgmr.msra.gmra.mxu1 %v1077_v3  ;;  %v1110_v34 = vld [vmem:[%s1610_s8 + $0x54] sm:$0xf0] }
  0x72   : > { %803 = vmatmul.bf16.vlgmr.msra.gmra.mxu2 %v1081_v4 }
  0x75   : > { %1372 = vmatpush.bf16.msrb.mxu3 %v1627_v37  ;;  %v1109_v37 = vor.u32 %v1278_v30, %v1108_v29  ;;  %v332_v29 = vld [vmem:[#allocation2 + $0x18] sm:$0xff] }
  0x79   : > { %1373 = vmatpush.bf16.msrb.mxu3 %v1305_v40 }
  0x7d   : > { %1374 = vmatpush.bf16.msrb.mxu3 %v1304_v43  ;;  %v1280_v43 = vld [vmem:[%s1610_s8 + $0x64] sm:$0xf] }
  0x80   : > { %710 = vmatmul.bf16.gmra.mxu0 %v1085_v13  ;;  %740 = vmatmul.bf16.gmra.mxu3 %v1157_v14  ;;  %v330_v13 = vld [vmem:[#allocation2] sm:$0xff] }
  0x81   : > { %1375 = vmatpush.bf16.msrb.mxu3 %v1303_v46  ;;  %759 = vmatmul.bf16.gmra.mxu1 %v1089_v15  ;;  %v1122_v46 = vld [vmem:[%s1610_s8 + $0x6c] sm:$0xf0] }
  0x82   : > { %808 = vmatmul.bf16.gmra.mxu2 %v1093_v16  ;;  %v1125_v51 = vor.u32 %v1280_v43, %v1122_v46 }
  0x85   : > { %1376 = vmatpush.bf16.msrb.mxu3 %v1302_v49 }
  0x89   : > { %1377 = vmatpush.bf16.msrb.mxu3 %v1301_v52 }
  0x8d   : > { %1378 = vmatpush.bf16.msrb.mxu3 %v1300_v55  ;;  %v1283_v55 = vld [vmem:[%s1610_s8 + $0x7c] sm:$0xf] }
  0x8e   : > { %v1137_v63 = vor.u32 %v1283_v55, %v1134_v58 }
  0x90   : > { %715 = vmatmul.bf16.gmra.mxu0 %v1097_v25  ;;  %784 = vmatmul.bf16.vlgmr.msrb.gmra.mxu3 %v1149_v26 }
  0x91   : > { %1379 = vmatpush.bf16.msra.mxu3 %v1621_v35  ;;  %764 = vmatmul.bf16.gmra.mxu1 %v1101_v27  ;;  %v1116_v35 = vld [vmem:[%s1610_s8 + $0x50] sm:$0xf] }
  0x92   : > { %813 = vmatmul.bf16.gmra.mxu2 %v1105_v28  ;;  %v1117_v40 = vor.u32 %v1279_v36, %v1116_v35 }
  0x95   : > { %1380 = vmatpush.bf16.msra.mxu3 %v1630_v38  ;;  %v1113_v38 = vor.u32 %v1277_v31, %v1110_v34 }
  0x99   : > { %1381 = vmatpush.bf16.msra.mxu3 %v1637_v41  ;;  %v1120_v41 = vld [vmem:[%s1610_s8 + $0x60] sm:$0xf] }
  0x9a   : > { %v1121_v49 = vor.u32 %v1281_v42, %v1120_v41 }
  0x9d   : > { %1382 = vmatpush.bf16.msra.mxu3 %v1643_v44  ;;  %v1152_v44 = vld [vmem:[%s1610_s8 + $0x98] sm:$0xf] }
  0xa0   : > { %720 = vmatmul.bf16.gmra.mxu0 %v1109_v37  ;;  %789 = vmatmul.bf16.gmra.mxu3 %v1161_v39  ;;  %v333_v37 = vld [vmem:[#allocation2 + $0x50] sm:$0xff] }
  0xa1   : > { %1383 = vmatpush.bf16.msra.mxu3 %v1649_v47  ;;  %769 = vmatmul.bf16.gmra.mxu1 %v1113_v38  ;;  %v1128_v47 = vld [vmem:[%s1610_s8 + $0x68] sm:$0xf] }
  0xa2   : > { %818 = vmatmul.bf16.gmra.mxu2 %v1117_v40  ;;  %v1129_v52 = vor.u32 %v1282_v48, %v1128_v47 }
  0xa5   : > { %1384 = vmatpush.bf16.msra.mxu3 %v1655_v50  ;;  %v1153_v50 = vor.u32 %v1288_v45, %v1152_v44  ;;  %v334_v45 = vld [vmem:[#allocation2 + $0x68] sm:$0xff] }
  0xa9   : > { %1385 = vmatpush.bf16.msra.mxu3 %v1661_v53  ;;  %v1132_v53 = vld [vmem:[%s1610_s8 + $0x78] sm:$0xf] }
  0xaa   : > { %v1133_v61 = vor.u32 %v1284_v54, %v1132_v53  ;;  %v335_v53 = vld [vmem:[#allocation2 + $0x8] sm:$0xff] }
  0xad   : > { %1386 = vmatpush.bf16.msra.mxu3 %v1666_v56  ;;  %v1291_v56 = vld [vmem:[%s1610_s8 + $0xb8] sm:$0xf0] }
  0xae   : > { %v1165_v62 = vor.u32 %v1291_v56, %v1164_v57 }
  0xb0   : > { %725 = vmatmul.bf16.gmra.mxu0 %v1121_v49  ;;  %833 = vmatmul.bf16.vlgmr.msra.gmra.mxu3 %v1153_v50 }
  0xb1   : > { %774 = vmatmul.bf16.gmra.mxu1 %v1125_v51 }
  0xb2   : > { %823 = vmatmul.bf16.gmra.mxu2 %v1129_v52 }
  0xc0   : > { %730 = vmatmul.bf16.gmra.mxu0 %v1133_v61  ;;  %838 = vmatmul.bf16.gmra.mxu3 %v1165_v62  ;;  %v336_v61 = vld [vmem:[#allocation2 + $0x48] sm:$0xff] }
  0xc1   : > { %779 = vmatmul.bf16.gmra.mxu1 %v1137_v63 }
  0xc2   : > { %828 = vmatmul.bf16.gmra.mxu2 %v1141_v0 }
  0xed   : > { %v706_v1 = vpop.f32.mrf.mxu0 }
  0xee   : > { %v755_v2 = vpop.f32.mrf.mxu1 }
  0xef   : > { %v756_v3 = vadd.f32 %v755_v2, %v706_v1 }
  0xf3   : > { %v1728_v4 = vpop.f32.mrf.mxu3 }
  0xf5   : > { %v804_v6 = vpop.f32.mrf.mxu2  ;;  %v708_v8 = vpop.f32.mrf.mxu0 }
  0xf6   : > { %v805_v7 = vadd.f32 %v804_v6, %v756_v3  ;;  %v757_v9 = vpop.f32.mrf.mxu1  ;;  %v341_v6 = vld [vmem:[#allocation2 + $0x60] sm:$0xff] }
  0xf7   : > { %v758_v11 = vadd.f32 %v757_v9, %v708_v8  ;;  %v337_v8 = vld [vmem:[#allocation2 + $0x40] sm:$0xff] }
  0xf8   : > { %v844_v10 = vadd.f32 %v805_v7, %v329_v5 }
  0xfa   : > { %860 = vst [vmem:[#allocation2 + $0x30] sm:$0xff] %v844_v10 }
  0xfb   : > { %v1730_v12 = vpop.f32.mrf.mxu3 }
  0xfd   : > { %v806_v14 = vpop.f32.mrf.mxu2  ;;  %v711_v16 = vpop.f32.mrf.mxu0 }
  0xfe   : > { %v807_v15 = vadd.f32 %v806_v14, %v758_v11  ;;  %v760_v17 = vpop.f32.mrf.mxu1 }
  0xff   : > { %v761_v19 = vadd.f32 %v760_v17, %v711_v16 }
 0x100   : > { %v845_v18 = vadd.f32 %v807_v15, %v330_v13 }
 0x102   : > { %861 = vst [vmem:[#allocation2] sm:$0xff] %v845_v18 }
 0x103   : > { %v1732_v20 = vpop.f32.mrf.mxu3 }
 0x105   : > { %v809_v22 = vpop.f32.mrf.mxu2  ;;  %v713_v24 = vpop.f32.mrf.mxu0 }
 0x106   : > { %v810_v23 = vadd.f32 %v809_v22, %v761_v19  ;;  %v762_v25 = vpop.f32.mrf.mxu1  ;;  %v342_v19 = vld [vmem:[#allocation2 + $0x70] sm:$0xff]  ;;  %v338_v22 = vld [vmem:[#allocation2 + $0x20] sm:$0xff] }
 0x107   : > { %v763_v27 = vadd.f32 %v762_v25, %v713_v24 }
 0x108   : > { %v846_v26 = vadd.f32 %v810_v23, %v331_v21 }
 0x10a   : > { %862 = vst [vmem:[#allocation2 + $0x58] sm:$0xff] %v846_v26 }
 0x10b   : > { %v1734_v28 = vpop.f32.mrf.mxu3 }
 0x10d   : > { %v811_v30 = vpop.f32.mrf.mxu2  ;;  %v716_v32 = vpop.f32.mrf.mxu0 }
 0x10e   : > { %v812_v31 = vadd.f32 %v811_v30, %v763_v27  ;;  %v765_v33 = vpop.f32.mrf.mxu1 }
 0x10f   : > { %v766_v35 = vadd.f32 %v765_v33, %v716_v32  ;;  %v343_v32 = vld [vmem:[#allocation2 + $0x78] sm:$0xff] }
 0x110   : > { %v847_v34 = vadd.f32 %v812_v31, %v332_v29 }
 0x112   : > { %863 = vst [vmem:[#allocation2 + $0x18] sm:$0xff] %v847_v34  ;;  %v339_v34 = vld [vmem:[#allocation2 + $0x10] sm:$0xff] }
 0x113   : > { %v785_v36 = vpop.f32.mrf.mxu3 }
 0x114   : > { %v786_v5 = vadd.f32 %v785_v36, %v1728_v4 }
 0x115   : > { %v814_v39 = vpop.f32.mrf.mxu2  ;;  %v718_v40 = vpop.f32.mrf.mxu0 }
 0x116   : > { %v815_v38 = vadd.f32 %v814_v39, %v766_v35  ;;  %v767_v41 = vpop.f32.mrf.mxu1 }
 0x117   : > { %v768_v43 = vadd.f32 %v767_v41, %v718_v40 }
 0x118   : > { %v848_v42 = vadd.f32 %v815_v38, %v333_v37 }
 0x11a   : > { %864 = vst [vmem:[#allocation2 + $0x50] sm:$0xff] %v848_v42 }
 0x11b   : > { %v787_v44 = vpop.f32.mrf.mxu3 }
 0x11c   : > { %v788_v17 = vadd.f32 %v787_v44, %v1730_v12 }
 0x11d   : > { %v816_v46 = vpop.f32.mrf.mxu2  ;;  %v721_v48 = vpop.f32.mrf.mxu0 }
 0x11e   : > { %v817_v47 = vadd.f32 %v816_v46, %v768_v43  ;;  %v770_v49 = vpop.f32.mrf.mxu1  ;;  %v344_v43 = vld [vmem:[#allocation2 + $0x28] sm:$0xff] }
 0x11f   : > { %v771_v51 = vadd.f32 %v770_v49, %v721_v48 }
 0x120   : > { %v849_v50 = vadd.f32 %v817_v47, %v334_v45  ;;  %v340_v45 = vld [vmem:[#allocation2 + $0x38] sm:$0xff] }
 0x122   : > { %865 = vst [vmem:[#allocation2 + $0x68] sm:$0xff] %v849_v50 }
 0x123   : > { %v790_v52 = vpop.f32.mrf.mxu3 }
 0x124   : > { %v791_v31 = vadd.f32 %v790_v52, %v1732_v20 }
 0x125   : > { %v819_v54 = vpop.f32.mrf.mxu2  ;;  %v723_v57 = vpop.f32.mrf.mxu0 }
 0x126   : > { %v820_v55 = vadd.f32 %v819_v54, %v771_v51  ;;  %v772_v56 = vpop.f32.mrf.mxu1 }
 0x127   : > { %v773_v59 = vadd.f32 %v772_v56, %v723_v57 }
 0x128   : > { %v850_v58 = vadd.f32 %v820_v55, %v335_v53 }
 0x12a   : > { %866 = vst [vmem:[#allocation2 + $0x8] sm:$0xff] %v850_v58 }
 0x12b   : > { %v792_v60 = vpop.f32.mrf.mxu3 }
 0x12c   : > { %v793_v41 = vadd.f32 %v792_v60, %v1734_v28 }
 0x12d   : > { %v821_v62 = vpop.f32.mrf.mxu2  ;;  %v726_v0 = vpop.f32.mrf.mxu0 }
 0x12e   : > { %v822_v63 = vadd.f32 %v821_v62, %v773_v59  ;;  %v775_v1 = vpop.f32.mrf.mxu1 }
 0x12f   : > { %v776_v3 = vadd.f32 %v775_v1, %v726_v0 }
 0x130   : > { %v851_v2 = vadd.f32 %v822_v63, %v336_v61 }
 0x132   : > { %867 = vst [vmem:[#allocation2 + $0x48] sm:$0xff] %v851_v2 }
 0x133   : > { %v834_v7 = vpop.f32.mrf.mxu3 }
 0x134   : > { %v835_v10 = vadd.f32 %v834_v7, %v786_v5 }
 0x135   : > { %v824_v9 = vpop.f32.mrf.mxu2  ;;  %v728_v13 = vpop.f32.mrf.mxu0 }
 0x136   : > { %v825_v11 = vadd.f32 %v824_v9, %v776_v3  ;;  %v856_v14 = vadd.f32 %v835_v10, %v341_v6  ;;  %v777_v15 = vpop.f32.mrf.mxu1 }
 0x137   : > { %v778_v18 = vadd.f32 %v777_v15, %v728_v13 }
 0x138   : > { %v852_v16 = vadd.f32 %v825_v11, %v337_v8  ;;  %872 = vst [vmem:[#allocation2 + $0x60] sm:$0xff] %v856_v14 }
 0x13a   : > { %868 = vst [vmem:[#allocation2 + $0x40] sm:$0xff] %v852_v16 }
 0x13b   : > { %v836_v21 = vpop.f32.mrf.mxu3 }
 0x13c   : > { %v837_v4 = vadd.f32 %v836_v21, %v788_v17 }
 0x13d   : > { %v826_v23 = vpop.f32.mrf.mxu2  ;;  %v731_v26 = vpop.f32.mrf.mxu0 }
 0x13e   : > { %v827_v24 = vadd.f32 %v826_v23, %v778_v18  ;;  %v857_v25 = vadd.f32 %v837_v4, %v342_v19  ;;  %v780_v27 = vpop.f32.mrf.mxu1 }
 0x13f   : > { %v781_v30 = vadd.f32 %v780_v27, %v731_v26 }
 0x140   : > { %v853_v29 = vadd.f32 %v827_v24, %v338_v22  ;;  %873 = vst [vmem:[#allocation2 + $0x70] sm:$0xff] %v857_v25 }
 0x142   : > { %869 = vst [vmem:[#allocation2 + $0x20] sm:$0xff] %v853_v29 }
 0x143   : > { %v839_v33 = vpop.f32.mrf.mxu3 }
 0x144   : > { %v840_v35 = vadd.f32 %v839_v33, %v791_v31 }
 0x145   : > { %v829_v12 = vpop.f32.mrf.mxu2  ;;  %v733_v38 = vpop.f32.mrf.mxu0 }
 0x146   : > { %v830_v36 = vadd.f32 %v829_v12, %v781_v30  ;;  %v858_v37 = vadd.f32 %v840_v35, %v343_v32  ;;  %v782_v40 = vpop.f32.mrf.mxu1 }
 0x147   : > { %v783_v42 = vadd.f32 %v782_v40, %v733_v38 }
 0x148   : > { %v854_v39 = vadd.f32 %v830_v36, %v339_v34  ;;  %874 = vst [vmem:[#allocation2 + $0x78] sm:$0xff] %v858_v37 }
 0x14a   : > { %870 = vst [vmem:[#allocation2 + $0x10] sm:$0xff] %v854_v39 }
 0x14b   : > { %v841_v44 = vpop.f32.mrf.mxu3 }
 0x14c   : > { %v842_v20 = vadd.f32 %v841_v44, %v793_v41 }
 0x14d   : > { %v831_v46 = vpop.f32.mrf.mxu2 }
 0x14e   : > { %v832_v47 = vadd.f32 %v831_v46, %v783_v42  ;;  %v859_v48 = vadd.f32 %v842_v20, %v344_v43  ;;  %879 = sbr.rel (%p1262_p11) target bundleno = 352 (0x160), region = 66 }
 0x150   : > { %v855_v49 = vadd.f32 %v832_v47, %v340_v45  ;;  %875 = vst [vmem:[#allocation2 + $0x28] sm:$0xff] %v859_v48 }
 0x152   : > { %871 = vst [vmem:[#allocation2 + $0x38] sm:$0xff] %v855_v49 }
 0x153   : > { %v880_v50 = vld [vmem:[#allocation2 + $0x30] sm:$0xff]  ;;  %v881_v51 = vld [vmem:[#allocation2] sm:$0xff]  ;;  %v882_v52 = vld [vmem:[#allocation2 + $0x58] sm:$0xff] }
 0x154   : > { %v896_v53 = vmax.f32 %v880_v50, 0.0  ;;  %v897_v54 = vmax.f32 %v881_v51, 0.0  ;;  %v883_v28 = vld [vmem:[#allocation2 + $0x18] sm:$0xff]  ;;  %v898_v55 = vmax.f32 %v882_v52, 0.0  ;;  %v884_v57 = vld [vmem:[#allocation2 + $0x50] sm:$0xff]  ;;  %v885_v56 = vld [vmem:[#allocation2 + $0x68] sm:$0xff] }
 0x155   : > { %v899_v58 = vmax.f32 %v883_v28, 0.0  ;;  %v900_v59 = vmax.f32 %v884_v57, 0.0  ;;  %v901_v60 = vmax.f32 %v885_v56, 0.0  ;;  %v886_v61 = vld [vmem:[#allocation2 + $0x8] sm:$0xff]  ;;  %v888_v63 = vld [vmem:[#allocation2 + $0x40] sm:$0xff]  ;;  %v890_v6 = vld [vmem:[#allocation2 + $0x10] sm:$0xff] }
 0x156   : > { %v887_v62 = vld [vmem:[#allocation2 + $0x48] sm:$0xff]  ;;  %v1319_v0 = vpack.c.bf16 %v897_v54, %v896_v53  ;;  %v902_v1 = vmax.f32 %v886_v61, 0.0  ;;  %v889_v3 = vld [vmem:[#allocation2 + $0x20] sm:$0xff]  ;;  %v904_v5 = vmax.f32 %v888_v63, 0.0  ;;  %v906_v11 = vmax.f32 %v890_v6, 0.0  ;;  %v893_v14 = vld [vmem:[#allocation2 + $0x70] sm:$0xff] }
 0x157   : > { %v903_v2 = vmax.f32 %v887_v62, 0.0  ;;  %v1324_v8 = vpack.c.bf16 %v899_v58, %v898_v55  ;;  %v1329_v9 = vpack.c.bf16 %v901_v60, %v900_v59  ;;  %v905_v10 = vmax.f32 %v889_v3, 0.0  ;;  %v892_v13 = vld [vmem:[#allocation2 + $0x60] sm:$0xff]  ;;  %v894_v15 = vld [vmem:[#allocation2 + $0x78] sm:$0xff]  ;;  %v895_v21 = vld [vmem:[#allocation2 + $0x28] sm:$0xff] }
 0x158   : > { %1320 = vst [vmem:[%s1783_s3] sm:$0xff] %v1319_v0   ;;  %v908_v18 = vmax.f32 %v892_v13, 0.0  ;;  %v909_v19 = vmax.f32 %v893_v14, 0.0  ;;  %v910_v23 = vmax.f32 %v894_v15, 0.0  ;;  %v911_v4 = vmax.f32 %v895_v21, 0.0 }
 0x159   : > { %v891_v7 = vld [vmem:[#allocation2 + $0x38] sm:$0xff]  ;;  %v1334_v16 = vpack.c.bf16 %v903_v2, %v902_v1  ;;  %1356 = vst [vmem:[%s1783_s3 + $0x8] sm:$0xff] %v1324_v8   ;;  %v1339_v22 = vpack.c.bf16 %v905_v10, %v904_v5 }
 0x15a   : > { %v907_v17 = vmax.f32 %v891_v7, 0.0  ;;  %1357 = vst [vmem:[%s1783_s3 + $0x10] sm:$0xff] %v1329_v9   ;;  %v1349_v25 = vpack.c.bf16 %v909_v19, %v908_v18  ;;  %v1354_v26 = vpack.c.bf16 %v911_v4, %v910_v23 }
 0x15b   : > { %1358 = vst [vmem:[%s1783_s3 + $0x18] sm:$0xff] %v1334_v16  }
 0x15c   : > { %v1344_v24 = vpack.c.bf16 %v907_v17, %v906_v11  ;;  %1359 = vst [vmem:[%s1783_s3 + $0x20] sm:$0xff] %v1339_v22  }
 0x15d   : > { %1361 = vst [vmem:[%s1783_s3 + $0x30] sm:$0xff] %v1349_v25  }
 0x15e   : > { %1360 = vst [vmem:[%s1783_s3 + $0x28] sm:$0xff] %v1344_v24  }
 0x15f   : > { %1362 = vst [vmem:[%s1783_s3 + $0x38] sm:$0xff] %v1354_v26  }
 0x160 PF: > { %s13_s16 = sadd.s32 1, %s1468_s16   ;;  %s1784_s12 = smov %s1456_s13 }
 0x161   : > { %p10_p12 = scmp.ge.s32.totalorder %s13_s16, 5   ;;  %s1785_s13 = smov %s1525_s20 }
 0x162   : > { %s1786_s14 = smov %s1464_s15  ;;  %s1787_s15 = smov %s1789_s17 }
 0x163   :  { %12 = sbr.rel (!%p10_p12) target bundleno = 3 (0x3), region = 110 }

// kernel: bottleneck_forward.5
= control target key start
LH: loop header
LB: loop body
LE: loop exit
PB: predicated region body
PF: predicated region fallthrough
CT: control target
= control target key end

     0   :  { %s648_s1 = inlined_call_operand.vmem [shape: bf16[128,128], index: 1, kind: input, shape index: {}]   ;;  %s649_s2 = inlined_call_operand.vmem [shape: f32[1,128], index: 2, kind: input, shape index: {}]   ;;  %s650_s0 = inlined_call_operand.vmem [shape: bf16[128,128], index: 0, kind: input, shape index: {}]   ;;  %s651_s3 = inlined_call_operand.vmem [shape: f32[128,128], index: 3, kind: input, shape index: {}]   ;;  %s652_s4 = inlined_call_operand.vmem [shape: f32[128,128], index: 4, kind: output, shape index: {}]  }
   0x1   :  { %v432_v0 = vld [vmem:[%s648_s1 + $0x38] sm:$0xff]  ;;  %v431_v1 = vld [vmem:[%s648_s1 + $0x30] sm:$0xff]  ;;  %v430_v2 = vld [vmem:[%s648_s1 + $0x28] sm:$0xff] }
   0x2   :  { %185 = vmatpush.bf16.msra.mxu0 %v432_v0  ;;  %433 = vmatpush.bf16.msra.mxu1 %v432_v0  ;;  %v429_v3 = vld [vmem:[%s648_s1 + $0x20] sm:$0xff]  ;;  %v428_v4 = vld [vmem:[%s648_s1 + $0x18] sm:$0xff]  ;;  %v427_v5 = vld [vmem:[%s648_s1 + $0x10] sm:$0xff] }
   0x3   :  { %434 = vmatpush.bf16.msra.mxu2 %v432_v0  ;;  %435 = vmatpush.bf16.msra.mxu3 %v432_v0  ;;  %v426_v6 = vld [vmem:[%s648_s1 + $0x8] sm:$0xff]  ;;  %v425_v7 = vld [vmem:[%s648_s1] sm:$0xff]  ;;  %v419_v9 = vld [vmem:[%s650_s0 + $0x10] sm:$0xff] }
   0x4   :  { %v417_v8 = vld [vmem:[%s650_s0] sm:$0xff]  ;;  %v423_v11 = vld [vmem:[%s650_s0 + $0x30] sm:$0xff]  ;;  %v418_v12 = vld [vmem:[%s650_s0 + $0x8] sm:$0xff] }
   0x5   :  { %v421_v10 = vld [vmem:[%s650_s0 + $0x20] sm:$0xff]  ;;  %v420_v13 = vld [vmem:[%s650_s0 + $0x18] sm:$0xff]  ;;  %v422_v14 = vld [vmem:[%s650_s0 + $0x28] sm:$0xff] }
   0x6   :  { %186 = vmatpush.bf16.msra.mxu0 %v431_v1  ;;  %436 = vmatpush.bf16.msra.mxu1 %v431_v1  ;;  %v424_v15 = vld [vmem:[%s650_s0 + $0x38] sm:$0xff]  ;;  %v534_v16 = vld [vmem:[%s649_s2] ss:$0 sm:$0xff]  ;;  %v286_v34 = vld [vmem:[%s651_s3 + $0x8] sm:$0xff] }
   0x7   :  { %437 = vmatpush.bf16.msra.mxu2 %v431_v1  ;;  %438 = vmatpush.bf16.msra.mxu3 %v431_v1  ;;  %v285_v18 = vld [vmem:[%s651_s3] sm:$0xff]  ;;  %v290_v36 = vld [vmem:[%s651_s3 + $0x28] sm:$0xff]  ;;  %v287_v54 = vld [vmem:[%s651_s3 + $0x10] sm:$0xff] }
   0x8   :  { %v289_v20 = vld [vmem:[%s651_s3 + $0x20] sm:$0xff]  ;;  %v294_v48 = vld [vmem:[%s651_s3 + $0x48] sm:$0xff]  ;;  %v291_v56 = vld [vmem:[%s651_s3 + $0x30] sm:$0xff] }
   0x9   :  { %v293_v28 = vld [vmem:[%s651_s3 + $0x40] sm:$0xff]  ;;  %v298_v50 = vld [vmem:[%s651_s3 + $0x68] sm:$0xff] }
   0xa   :  { %187 = vmatpush.bf16.msra.mxu0 %v430_v2  ;;  %439 = vmatpush.bf16.msra.mxu1 %v430_v2  ;;  %v297_v30 = vld [vmem:[%s651_s3 + $0x60] sm:$0xff] }
   0xb   :  { %440 = vmatpush.bf16.msra.mxu2 %v430_v2  ;;  %441 = vmatpush.bf16.msra.mxu3 %v430_v2 }
   0xe   :  { %188 = vmatpush.bf16.msra.mxu0 %v429_v3  ;;  %442 = vmatpush.bf16.msra.mxu1 %v429_v3 }
   0xf   :  { %443 = vmatpush.bf16.msra.mxu2 %v429_v3  ;;  %444 = vmatpush.bf16.msra.mxu3 %v429_v3 }
  0x12   :  { %189 = vmatpush.bf16.msra.mxu0 %v428_v4  ;;  %445 = vmatpush.bf16.msra.mxu1 %v428_v4 }
  0x13   :  { %446 = vmatpush.bf16.msra.mxu2 %v428_v4  ;;  %447 = vmatpush.bf16.msra.mxu3 %v428_v4  ;;  %v295_v4 = vld [vmem:[%s651_s3 + $0x50] sm:$0xff] }
  0x16   :  { %190 = vmatpush.bf16.msra.mxu0 %v427_v5  ;;  %448 = vmatpush.bf16.msra.mxu1 %v427_v5 }
  0x17   :  { %449 = vmatpush.bf16.msra.mxu2 %v427_v5  ;;  %450 = vmatpush.bf16.msra.mxu3 %v427_v5 }
  0x1a   :  { %191 = vmatpush.bf16.msra.mxu0 %v426_v6  ;;  %451 = vmatpush.bf16.msra.mxu1 %v426_v6 }
  0x1b   :  { %452 = vmatpush.bf16.msra.mxu2 %v426_v6  ;;  %453 = vmatpush.bf16.msra.mxu3 %v426_v6  ;;  %v299_v6 = vld [vmem:[%s651_s3 + $0x70] sm:$0xff] }
  0x1e   :  { %192 = vmatpush.bf16.msra.mxu0 %v425_v7  ;;  %454 = vmatpush.bf16.msra.mxu1 %v425_v7 }
  0x1f   :  { %455 = vmatpush.bf16.msra.mxu2 %v425_v7  ;;  %456 = vmatpush.bf16.msra.mxu3 %v425_v7 }
  0x21   :  { %193 = vmatmul.bf16.vlgmr.msra.gmra.mxu0 %v417_v8  ;;  %203 = vmatmul.bf16.vlgmr.msra.gmra.mxu1 %v419_v9 }
  0x22   :  { %213 = vmatmul.bf16.vlgmr.msra.gmra.mxu2 %v421_v10  ;;  %223 = vmatmul.bf16.vlgmr.msra.gmra.mxu3 %v423_v11  ;;  %v288_v10 = vld [vmem:[%s651_s3 + $0x18] sm:$0xff] }
  0x31   :  { %198 = vmatmul.bf16.gmra.mxu0 %v418_v12  ;;  %208 = vmatmul.bf16.gmra.mxu1 %v420_v13  ;;  %v292_v12 = vld [vmem:[%s651_s3 + $0x38] sm:$0xff] }
  0x32   :  { %218 = vmatmul.bf16.gmra.mxu2 %v422_v14  ;;  %228 = vmatmul.bf16.gmra.mxu3 %v424_v15 }
  0x9e   :  { %v194_v17 = vpop.f32.mrf.mxu0  ;;  %v204_v19 = vpop.f32.mrf.mxu1 }
  0x9f   :  { %v234_v21 = vadd.f32 %v534_v16, %v194_v17  ;;  %v238_v22 = vadd.f32 %v534_v16, %v204_v19 }
  0xa1   :  { %v301_v23 = vadd.f32 %v285_v18, %v234_v21  ;;  %v305_v24 = vadd.f32 %v289_v20, %v238_v22 }
  0xa3   :  { %v317_v25 = vmax.f32 %v301_v23, 0.0  ;;  %v321_v26 = vmax.f32 %v305_v24, 0.0 }
  0xa5   :  { %333 = vst [vmem:[%s652_s4] sm:$0xff] %v317_v25  ;;  %v214_v27 = vpop.f32.mrf.mxu2  ;;  %v224_v29 = vpop.f32.mrf.mxu3  ;;  %v296_v25 = vld [vmem:[%s651_s3 + $0x58] sm:$0xff] }
  0xa6   :  { %337 = vst [vmem:[%s652_s4 + $0x20] sm:$0xff] %v321_v26  ;;  %v242_v31 = vadd.f32 %v534_v16, %v214_v27  ;;  %v246_v32 = vadd.f32 %v534_v16, %v224_v29  ;;  %v196_v33 = vpop.f32.mrf.mxu0  ;;  %v206_v35 = vpop.f32.mrf.mxu1  ;;  %v300_v27 = vld [vmem:[%s651_s3 + $0x78] sm:$0xff] }
  0xa7   :  { %v235_v37 = vadd.f32 %v534_v16, %v196_v33  ;;  %v239_v38 = vadd.f32 %v534_v16, %v206_v35 }
  0xa8   :  { %v309_v39 = vadd.f32 %v293_v28, %v242_v31  ;;  %v313_v40 = vadd.f32 %v297_v30, %v246_v32 }
  0xa9   :  { %v302_v41 = vadd.f32 %v286_v34, %v235_v37  ;;  %v306_v42 = vadd.f32 %v290_v36, %v239_v38 }
  0xaa   :  { %v325_v43 = vmax.f32 %v309_v39, 0.0  ;;  %v329_v44 = vmax.f32 %v313_v40, 0.0 }
  0xab   :  { %v318_v45 = vmax.f32 %v302_v41, 0.0  ;;  %v322_v46 = vmax.f32 %v306_v42, 0.0 }
  0xac   :  { %341 = vst [vmem:[%s652_s4 + $0x40] sm:$0xff] %v325_v43 }
  0xad   :  { %345 = vst [vmem:[%s652_s4 + $0x60] sm:$0xff] %v329_v44  ;;  %v216_v47 = vpop.f32.mrf.mxu2  ;;  %v226_v49 = vpop.f32.mrf.mxu3 }
  0xae   :  { %334 = vst [vmem:[%s652_s4 + $0x8] sm:$0xff] %v318_v45  ;;  %v243_v51 = vadd.f32 %v534_v16, %v216_v47  ;;  %v247_v52 = vadd.f32 %v534_v16, %v226_v49  ;;  %v199_v53 = vpop.f32.mrf.mxu0  ;;  %v209_v55 = vpop.f32.mrf.mxu1 }
  0xaf   :  { %338 = vst [vmem:[%s652_s4 + $0x28] sm:$0xff] %v322_v46  ;;  %v236_v57 = vadd.f32 %v534_v16, %v199_v53  ;;  %v240_v58 = vadd.f32 %v534_v16, %v209_v55 }
  0xb0   :  { %v310_v59 = vadd.f32 %v294_v48, %v243_v51  ;;  %v314_v60 = vadd.f32 %v298_v50, %v247_v52 }
  0xb1   :  { %v303_v61 = vadd.f32 %v287_v54, %v236_v57  ;;  %v307_v62 = vadd.f32 %v291_v56, %v240_v58 }
  0xb2   :  { %v326_v63 = vmax.f32 %v310_v59, 0.0  ;;  %v330_v0 = vmax.f32 %v314_v60, 0.0 }
  0xb3   :  { %v319_v1 = vmax.f32 %v303_v61, 0.0  ;;  %v323_v2 = vmax.f32 %v307_v62, 0.0 }
  0xb4   :  { %342 = vst [vmem:[%s652_s4 + $0x48] sm:$0xff] %v326_v63 }
  0xb5   :  { %346 = vst [vmem:[%s652_s4 + $0x68] sm:$0xff] %v330_v0  ;;  %v219_v3 = vpop.f32.mrf.mxu2  ;;  %v229_v5 = vpop.f32.mrf.mxu3 }
  0xb6   :  { %335 = vst [vmem:[%s652_s4 + $0x10] sm:$0xff] %v319_v1  ;;  %v244_v7 = vadd.f32 %v534_v16, %v219_v3  ;;  %v248_v8 = vadd.f32 %v534_v16, %v229_v5  ;;  %v201_v9 = vpop.f32.mrf.mxu0  ;;  %v211_v11 = vpop.f32.mrf.mxu1 }
  0xb7   :  { %339 = vst [vmem:[%s652_s4 + $0x30] sm:$0xff] %v323_v2  ;;  %v237_v13 = vadd.f32 %v534_v16, %v201_v9  ;;  %v241_v14 = vadd.f32 %v534_v16, %v211_v11 }
  0xb8   :  { %v311_v15 = vadd.f32 %v295_v4, %v244_v7  ;;  %v315_v17 = vadd.f32 %v299_v6, %v248_v8 }
  0xb9   :  { %v304_v18 = vadd.f32 %v288_v10, %v237_v13  ;;  %v308_v19 = vadd.f32 %v292_v12, %v241_v14 }
  0xba   :  { %v327_v20 = vmax.f32 %v311_v15, 0.0  ;;  %v331_v21 = vmax.f32 %v315_v17, 0.0 }
  0xbb   :  { %v320_v22 = vmax.f32 %v304_v18, 0.0  ;;  %v324_v23 = vmax.f32 %v308_v19, 0.0 }
  0xbc   :  { %343 = vst [vmem:[%s652_s4 + $0x50] sm:$0xff] %v327_v20 }
  0xbd   :  { %347 = vst [vmem:[%s652_s4 + $0x70] sm:$0xff] %v331_v21  ;;  %v221_v24 = vpop.f32.mrf.mxu2  ;;  %v231_v26 = vpop.f32.mrf.mxu3 }
  0xbe   :  { %336 = vst [vmem:[%s652_s4 + $0x18] sm:$0xff] %v320_v22  ;;  %v245_v28 = vadd.f32 %v534_v16, %v221_v24  ;;  %v249_v29 = vadd.f32 %v534_v16, %v231_v26 }
  0xbf   :  { %340 = vst [vmem:[%s652_s4 + $0x38] sm:$0xff] %v324_v23 }
  0xc0   :  { %v312_v30 = vadd.f32 %v296_v25, %v245_v28  ;;  %v316_v31 = vadd.f32 %v300_v27, %v249_v29 }
  0xc2   :  { %v328_v32 = vmax.f32 %v312_v30, 0.0  ;;  %v332_v33 = vmax.f32 %v316_v31, 0.0 }
  0xc4   :  { %344 = vst [vmem:[%s652_s4 + $0x58] sm:$0xff] %v328_v32 }
  0xc5   :  { %348 = vst [vmem:[%s652_s4 + $0x78] sm:$0xff] %v332_v33 }

</bundles_post_ra>
